<compile_context>
chip_gen: v6e
topology: v6e:2x2x1
jax: 0.10.0
libtpu: 0.0.40
codegen_flags: <defaults>
</compile_context>

<pallas_src>
import math

import jax
import jax.numpy as jnp
from jax import lax
from jax.experimental import pallas as pl
from jax.experimental.pallas import tpu as pltpu

F32 = jnp.float32
NEG_INF = -1e30


# --------------------------------------------------------------------------
# Single fused kernel: the entire Model.forward
# --------------------------------------------------------------------------
def fused_forward_kernel(
    # data
    node_feats_ref, edge_feats_ref, node_time_ref, edge_time_ref, seed_time_ref,
    node_batch_ref, n_id_ref, src_ref, dst_col_ref, dst_row_ref,
    # tabular encoders
    enc_w_ref, enc_b_ref, eenc_w_ref, eenc_b_ref,
    # temporal encoders (concat-free: sin/cos halves of the Linear weight)
    t_w_sin_ref, t_w_cos_ref, t_b_ref,
    te_w_sin_ref, te_w_cos_ref, te_b_ref,
    div_node_ref, div_edge_ref,
    # shallow embedding table
    shallow_ref,
    # stacked GAT params
    gat_w_ref, gat_a_ref, gat_ae_ref, gat_b_ref,
    # head
    head_w_ref, head_b_ref,
    # output
    out_ref,
):
    N = node_feats_ref.shape[0]
    E = edge_feats_ref.shape[0]
    S = seed_time_ref.shape[0]
    G = shallow_ref.shape[0]
    L = gat_w_ref.shape[0]
    f32 = jnp.float32

    # ---- HeteroEncoder_with_edge_features (linear tabular encoders) ----
    x = jnp.dot(node_feats_ref[...], enc_w_ref[...],
                preferred_element_type=f32) + enc_b_ref[...]            # [N,C]
    edge_emb = jnp.dot(edge_feats_ref[...], eenc_w_ref[...],
                       preferred_element_type=f32) + eenc_b_ref[...]    # [E,Ce]

    # ---- one-hot index matrices (in-kernel: no XLA scatter/gather glue) ----
    iota_ns = lax.broadcasted_iota(jnp.int32, (N, S), 1)
    nb_onehot = (node_batch_ref[...] == iota_ns).astype(f32)            # [N,S]
    iota_en = lax.broadcasted_iota(jnp.int32, (E, N), 1)
    src_onehot = (src_ref[...] == iota_en).astype(f32)                  # [E,N]
    dst_onehot = (dst_col_ref[...] == iota_en).astype(f32)              # [E,N]
    iota_ne = lax.broadcasted_iota(jnp.int32, (N, E), 0)
    dst_onehot_t = (dst_row_ref[...] == iota_ne).astype(f32)            # [N,E]
    iota_ng = lax.broadcasted_iota(jnp.int32, (N, G), 1)
    nid_onehot = (n_id_ref[...] == iota_ng).astype(f32)                 # [N,G]

    # ---- HeteroTemporalEncoder_with_edge_features ----
    # seed_time gathers expressed as tiny one-hot matmuls (MXU, in-register).
    node_seed_t = jnp.dot(nb_onehot, seed_time_ref[...],
                          preferred_element_type=f32)                   # [N,1]
    node_rel_t = node_seed_t - node_time_ref[...]                       # [N,1]
    edge_seed_t = jnp.dot(dst_onehot, node_seed_t,
                          preferred_element_type=f32)                   # [E,1]
    edge_rel_t = edge_seed_t - edge_time_ref[...]                       # [E,1]

    arg_n = node_rel_t * div_node_ref[...]                              # [N,C//2]
    node_t_emb = (jnp.dot(jnp.sin(arg_n), t_w_sin_ref[...], preferred_element_type=f32)
                  + jnp.dot(jnp.cos(arg_n), t_w_cos_ref[...], preferred_element_type=f32)
                  + t_b_ref[...])                                       # [N,C]
    arg_e = edge_rel_t * div_edge_ref[...]                              # [E,Ce//2]
    edge_t_emb = (jnp.dot(jnp.sin(arg_e), te_w_sin_ref[...], preferred_element_type=f32)
                  + jnp.dot(jnp.cos(arg_e), te_w_cos_ref[...], preferred_element_type=f32)
                  + te_b_ref[...])                                      # [E,Ce]

    # ---- shallow embedding add (gather as one-hot matmul) ----
    shallow = jnp.dot(nid_onehot, shallow_ref[...],
                      preferred_element_type=f32)                       # [N,C]

    x = x + node_t_emb + shallow
    edge_sum = edge_emb + edge_t_emb        # loop-invariant: hoisted out of GAT loop

    # ---- dense adjacency + masked-softmax bias (computed once) ----
    adj = jnp.dot(dst_onehot_t, src_onehot, preferred_element_type=f32)  # [N,N] edge counts
    iota_r = lax.broadcasted_iota(jnp.int32, (N, N), 0)
    iota_c = lax.broadcasted_iota(jnp.int32, (N, N), 1)
    eye = (iota_r == iota_c).astype(f32)
    mask = jnp.maximum(jnp.minimum(adj, 1.0), eye)                       # + self loops
    neg_bias = jnp.where(mask > 0.0, 0.0, NEG_INF)                       # additive mask

    # ---- HeteroGAT layers (L is static: Python-unrolled, x stays in vregs) ----
    for l in range(L):
        e_score = jnp.dot(edge_sum, gat_ae_ref[l],
                          preferred_element_type=f32)                    # [E,1]
        # scatter of per-edge logits onto [dst, src] as a matmul
        # TODO(synk): parallel edges between the same (dst, src) pair have their
        # logits summed here instead of being separate softmax terms as in PyG.
        e_dense = jnp.dot(dst_onehot_t, e_score * src_onehot,
                          preferred_element_type=f32)                    # [N,N]

        h = jnp.dot(x, gat_w_ref[l], preferred_element_type=f32)         # [N,C]
        a_l = gat_a_ref[l]                                               # [C,2]: 0=a_dst, 1=a_src
        dst_contrib = jnp.dot(h, a_l[:, 0:1], preferred_element_type=f32)       # [N,1] rows=dst
        src_contrib = jnp.transpose(
            jnp.dot(h, a_l[:, 1:2], preferred_element_type=f32))                # [1,N] cols=src

        scores = dst_contrib + src_contrib + e_dense                     # [N,N]
        scores = jnp.where(scores > 0, scores, 0.2 * scores)             # LeakyReLU(0.2)
        scores = scores + neg_bias                                       # mask
        m = jnp.max(scores, axis=-1, keepdims=True)
        p = jnp.exp(scores - m)
        denom = jnp.sum(p, axis=-1, keepdims=True)
        attn = p * pl.reciprocal(denom, approx=True)                     # EUP recip
        out = jnp.dot(attn, h, preferred_element_type=f32) + gat_b_ref[l]
        # ReLU only BETWEEN layers (not after the last conv)
        x = jnp.maximum(out, 0.0) if l < L - 1 else out

    # ---- head(x[:num_seed]) = Linear + Sigmoid ----
    z = jnp.dot(x[:S], head_w_ref[...], preferred_element_type=f32) + head_b_ref[...]
    out_ref[...] = 1.0 / (1.0 + jnp.exp(-z))


# --------------------------------------------------------------------------
# Parameter init (deterministic, synthetic)
# --------------------------------------------------------------------------
def init_params(key, f_node, f_edge, c_node, c_edge, out_ch, num_layers,
                num_global_nodes):
    ks = iter(jax.random.split(key, 64))
    nrm = lambda k, s: (0.1 * jax.random.normal(k, s)).astype(F32)
    half_n, half_e = c_node // 2, c_edge // 2
    p = {
        "enc_w": nrm(next(ks), (f_node, c_node)),
        "enc_b": nrm(next(ks), (1, c_node)),
        "edge_enc_w": nrm(next(ks), (f_edge, c_edge)),
        "edge_enc_b": nrm(next(ks), (1, c_edge)),
        # temporal Linear weight split into sin/cos halves (concat-free kernel)
        "t_w_sin": nrm(next(ks), (half_n, c_node)),
        "t_w_cos": nrm(next(ks), (half_n, c_node)),
        "t_b": nrm(next(ks), (1, c_node)),
        "te_w_sin": nrm(next(ks), (half_e, c_edge)),
        "te_w_cos": nrm(next(ks), (half_e, c_edge)),
        "te_b": nrm(next(ks), (1, c_edge)),
        "shallow_emb": nrm(next(ks), (num_global_nodes, c_node)),
        # GAT params stacked over layers; gat_a[:, :, 0] = a_dst, [:, :, 1] = a_src
        "gat_w": nrm(next(ks), (num_layers, c_node, c_node)),
        "gat_a": nrm(next(ks), (num_layers, c_node, 2)),
        "gat_ae": nrm(next(ks), (num_layers, c_edge, 1)),
        "gat_b": nrm(next(ks), (num_layers, 1, c_node)),
        "head_w": nrm(next(ks), (c_node, out_ch)),
        "head_b": nrm(next(ks), (1, out_ch)),
        # fixed positional-encoding frequencies
        "div_node": jnp.exp(-math.log(10000.0)
                            * jnp.arange(half_n, dtype=F32) / half_n)[None, :],
        "div_edge": jnp.exp(-math.log(10000.0)
                            * jnp.arange(half_e, dtype=F32) / half_e)[None, :],
    }
    return p


# --------------------------------------------------------------------------
# Forward pass: ONE pallas_call, everything VMEM-resident
# --------------------------------------------------------------------------
@jax.jit
def model_forward(params, node_feats, node_time, node_batch, n_id,
                  edge_feats, edge_time, edge_index, seed_time):
    N = node_feats.shape[0]
    E = edge_feats.shape[0]
    S = seed_time.shape[0]
    out_ch = params["head_w"].shape[1]

    node_time2 = node_time.astype(F32).reshape(N, 1)
    edge_time2 = edge_time.astype(F32).reshape(E, 1)
    seed_time2 = seed_time.astype(F32).reshape(S, 1)
    node_batch2 = node_batch.astype(jnp.int32).reshape(N, 1)
    n_id2 = n_id.astype(jnp.int32).reshape(N, 1)
    src = edge_index[0].astype(jnp.int32).reshape(E, 1)
    dst_col = edge_index[1].astype(jnp.int32).reshape(E, 1)
    dst_row = edge_index[1].astype(jnp.int32).reshape(1, E)

    args = (
        node_feats.astype(F32), edge_feats.astype(F32),
        node_time2, edge_time2, seed_time2,
        node_batch2, n_id2, src, dst_col, dst_row,
        params["enc_w"], params["enc_b"],
        params["edge_enc_w"], params["edge_enc_b"],
        params["t_w_sin"], params["t_w_cos"], params["t_b"],
        params["te_w_sin"], params["te_w_cos"], params["te_b"],
        params["div_node"], params["div_edge"],
        params["shallow_emb"],
        params["gat_w"], params["gat_a"], params["gat_ae"], params["gat_b"],
        params["head_w"], params["head_b"],
    )

    return pl.pallas_call(
        fused_forward_kernel,
        out_shape=jax.ShapeDtypeStruct((S, out_ch), F32),
        in_specs=[pl.BlockSpec(memory_space=pltpu.MemorySpace.VMEM)] * len(args),
        out_specs=pl.BlockSpec(memory_space=pltpu.MemorySpace.VMEM),
    )(*args)


# --------------------------------------------------------------------------
# Main
# --------------------------------------------------------------------------
if __name__ == "__main__":
    # small synthetic "batch"
    N, E = 16, 32                  # nodes / edges in the sampled subgraph
    F_NODE, F_EDGE = 8, 6          # raw tabular feature dims
    C_NODE, C_EDGE = 32, 32        # node_channels / edge_channels
    OUT_CH = 1                     # out_channels
    NUM_LAYERS = 2
    NUM_SEED = 4
    NUM_GLOBAL_NODES = 64          # size of the shallow embedding table

    key = jax.random.PRNGKey(0)
    k_par, k_nf, k_nt, k_ef, k_et, k_ei, k_st = jax.random.split(key, 7)

    params = init_params(k_par, F_NODE, F_EDGE, C_NODE, C_EDGE,
                         OUT_CH, NUM_LAYERS, NUM_GLOBAL_NODES)

    node_feats = jax.random.normal(k_nf, (N, F_NODE), dtype=F32)
    node_time = jax.random.uniform(k_nt, (N,), dtype=F32)
    node_batch = jnp.arange(N, dtype=jnp.int32) % NUM_SEED     # seed assignment
    n_id = jnp.arange(N, dtype=jnp.int32)                      # global node ids
    edge_feats = jax.random.normal(k_ef, (E, F_EDGE), dtype=F32)
    edge_time = jax.random.uniform(k_et, (E,), dtype=F32)
    edge_index = jax.random.randint(k_ei, (2, E), 0, N, dtype=jnp.int32)
    seed_time = jax.random.uniform(k_st, (NUM_SEED,), dtype=F32) + 1.0

    out = model_forward(params, node_feats, node_time, node_batch, n_id,
                        edge_feats, edge_time, edge_index, seed_time)
    jax.block_until_ready(out)
    assert out.shape == (NUM_SEED, OUT_CH)
    assert bool(jnp.all((out >= 0.0) & (out <= 1.0)))
    # TODO(synk): full HeteroData multi-type dict handling (per-type encoders /
    # per-edge-type GAT convs, norm layers) is collapsed to a single node & edge type.
    print("KERNEL_OK")
</pallas_src>

<mosaic_0001>
module attributes {stable_mosaic.version = 11 : i64} {
  func.func @fused_forward_kernel(%arg0: memref<16x8xf32, #tpu.memory_space<vmem>>, %arg1: memref<32x6xf32, #tpu.memory_space<vmem>>, %arg2: memref<16x1xf32, #tpu.memory_space<vmem>>, %arg3: memref<32x1xf32, #tpu.memory_space<vmem>>, %arg4: memref<4x1xf32, #tpu.memory_space<vmem>>, %arg5: memref<16x1xi32, #tpu.memory_space<vmem>>, %arg6: memref<16x1xi32, #tpu.memory_space<vmem>>, %arg7: memref<32x1xi32, #tpu.memory_space<vmem>>, %arg8: memref<32x1xi32, #tpu.memory_space<vmem>>, %arg9: memref<1x32xi32, #tpu.memory_space<vmem>>, %arg10: memref<8x32xf32, #tpu.memory_space<vmem>>, %arg11: memref<1x32xf32, #tpu.memory_space<vmem>>, %arg12: memref<6x32xf32, #tpu.memory_space<vmem>>, %arg13: memref<1x32xf32, #tpu.memory_space<vmem>>, %arg14: memref<16x32xf32, #tpu.memory_space<vmem>>, %arg15: memref<16x32xf32, #tpu.memory_space<vmem>>, %arg16: memref<1x32xf32, #tpu.memory_space<vmem>>, %arg17: memref<16x32xf32, #tpu.memory_space<vmem>>, %arg18: memref<16x32xf32, #tpu.memory_space<vmem>>, %arg19: memref<1x32xf32, #tpu.memory_space<vmem>>, %arg20: memref<1x16xf32, #tpu.memory_space<vmem>>, %arg21: memref<1x16xf32, #tpu.memory_space<vmem>>, %arg22: memref<64x32xf32, #tpu.memory_space<vmem>>, %arg23: memref<2x32x32xf32, #tpu.memory_space<vmem>>, %arg24: memref<2x32x2xf32, #tpu.memory_space<vmem>>, %arg25: memref<2x32x1xf32, #tpu.memory_space<vmem>>, %arg26: memref<2x1x32xf32, #tpu.memory_space<vmem>>, %arg27: memref<32x1xf32, #tpu.memory_space<vmem>>, %arg28: memref<1x1xf32, #tpu.memory_space<vmem>>, %arg29: memref<4x1xf32, #tpu.memory_space<vmem>>) attributes {dimension_semantics = [], scalar_prefetch = 0 : i64, scratch_operands = 0 : i64, tpu.core_type = #tpu.core_type<tc>} {
    %c0 = arith.constant 0 : index
    %c0_0 = arith.constant 0 : index
    %0 = vector.load %arg0[%c0, %c0_0] : memref<16x8xf32, #tpu.memory_space<vmem>>, vector<16x8xf32>
    %c0_1 = arith.constant 0 : index
    %c0_2 = arith.constant 0 : index
    %1 = vector.load %arg10[%c0_1, %c0_2] : memref<8x32xf32, #tpu.memory_space<vmem>>, vector<8x32xf32>
    %cst = arith.constant dense<0.000000e+00> : vector<16x32xf32>
    %2 = tpu.matmul %0, %1, %cst {dimension_numbers = #tpu.dot_dimension_numbers<[1], [0], [0], [1], [0, 0, 1, 1], [], []>} : vector<16x8xf32>, vector<8x32xf32>, vector<16x32xf32> -> vector<16x32xf32>
    %c0_3 = arith.constant 0 : index
    %c0_4 = arith.constant 0 : index
    %3 = vector.load %arg11[%c0_3, %c0_4] : memref<1x32xf32, #tpu.memory_space<vmem>>, vector<1x32xf32>
    %4 = vector.broadcast %3 : vector<1x32xf32> to vector<16x32xf32>
    %5 = arith.addf %2, %4 : vector<16x32xf32>
    %c0_5 = arith.constant 0 : index
    %c0_6 = arith.constant 0 : index
    %6 = vector.load %arg1[%c0_5, %c0_6] : memref<32x6xf32, #tpu.memory_space<vmem>>, vector<32x6xf32>
    %c0_7 = arith.constant 0 : index
    %c0_8 = arith.constant 0 : index
    %7 = vector.load %arg12[%c0_7, %c0_8] : memref<6x32xf32, #tpu.memory_space<vmem>>, vector<6x32xf32>
    %cst_9 = arith.constant dense<0.000000e+00> : vector<32x32xf32>
    %8 = tpu.matmul %6, %7, %cst_9 {dimension_numbers = #tpu.dot_dimension_numbers<[1], [0], [0], [1], [0, 0, 1, 1], [], []>} : vector<32x6xf32>, vector<6x32xf32>, vector<32x32xf32> -> vector<32x32xf32>
    %c0_10 = arith.constant 0 : index
    %c0_11 = arith.constant 0 : index
    %9 = vector.load %arg13[%c0_10, %c0_11] : memref<1x32xf32, #tpu.memory_space<vmem>>, vector<1x32xf32>
    %10 = vector.broadcast %9 : vector<1x32xf32> to vector<32x32xf32>
    %11 = arith.addf %8, %10 : vector<32x32xf32>
    %12 = tpu.iota {dimensions = array<i32: 1>} : vector<16x4xi32>
    %c0_12 = arith.constant 0 : index
    %c0_13 = arith.constant 0 : index
    %13 = vector.load %arg5[%c0_12, %c0_13] : memref<16x1xi32, #tpu.memory_space<vmem>>, vector<16x1xi32>
    %14 = vector.broadcast %13 : vector<16x1xi32> to vector<16x4xi32>
    %15 = arith.cmpi eq, %14, %12 : vector<16x4xi32>
    %16 = arith.extui %15 : vector<16x4xi1> to vector<16x4xi32>
    %17 = arith.sitofp %16 : vector<16x4xi32> to vector<16x4xf32>
    %18 = tpu.iota {dimensions = array<i32: 1>} : vector<32x16xi32>
    %c0_14 = arith.constant 0 : index
    %c0_15 = arith.constant 0 : index
    %19 = vector.load %arg7[%c0_14, %c0_15] : memref<32x1xi32, #tpu.memory_space<vmem>>, vector<32x1xi32>
    %20 = vector.broadcast %19 : vector<32x1xi32> to vector<32x16xi32>
    %21 = arith.cmpi eq, %20, %18 : vector<32x16xi32>
    %22 = arith.extui %21 : vector<32x16xi1> to vector<32x16xi32>
    %23 = arith.sitofp %22 : vector<32x16xi32> to vector<32x16xf32>
    %c0_16 = arith.constant 0 : index
    %c0_17 = arith.constant 0 : index
    %24 = vector.load %arg8[%c0_16, %c0_17] : memref<32x1xi32, #tpu.memory_space<vmem>>, vector<32x1xi32>
    %25 = vector.broadcast %24 : vector<32x1xi32> to vector<32x16xi32>
    %26 = arith.cmpi eq, %25, %18 : vector<32x16xi32>
    %27 = arith.extui %26 : vector<32x16xi1> to vector<32x16xi32>
    %28 = arith.sitofp %27 : vector<32x16xi32> to vector<32x16xf32>
    %29 = tpu.iota {dimensions = array<i32: 0>} : vector<16x32xi32>
    %c0_18 = arith.constant 0 : index
    %c0_19 = arith.constant 0 : index
    %30 = vector.load %arg9[%c0_18, %c0_19] : memref<1x32xi32, #tpu.memory_space<vmem>>, vector<1x32xi32>
    %31 = vector.broadcast %30 : vector<1x32xi32> to vector<16x32xi32>
    %32 = arith.cmpi eq, %31, %29 : vector<16x32xi32>
    %33 = arith.extui %32 : vector<16x32xi1> to vector<16x32xi32>
    %34 = arith.sitofp %33 : vector<16x32xi32> to vector<16x32xf32>
    %35 = tpu.iota {dimensions = array<i32: 1>} : vector<16x64xi32>
    %c0_20 = arith.constant 0 : index
    %c0_21 = arith.constant 0 : index
    %36 = vector.load %arg6[%c0_20, %c0_21] : memref<16x1xi32, #tpu.memory_space<vmem>>, vector<16x1xi32>
    %37 = vector.broadcast %36 : vector<16x1xi32> to vector<16x64xi32>
    %38 = arith.cmpi eq, %37, %35 : vector<16x64xi32>
    %39 = arith.extui %38 : vector<16x64xi1> to vector<16x64xi32>
    %40 = arith.sitofp %39 : vector<16x64xi32> to vector<16x64xf32>
    %c0_22 = arith.constant 0 : index
    %c0_23 = arith.constant 0 : index
    %41 = vector.load %arg4[%c0_22, %c0_23] : memref<4x1xf32, #tpu.memory_space<vmem>>, vector<4x1xf32>
    %cst_24 = arith.constant dense<0.000000e+00> : vector<16x1xf32>
    %42 = tpu.matmul %17, %41, %cst_24 {dimension_numbers = #tpu.dot_dimension_numbers<[1], [0], [0], [1], [0, 0, 1, 1], [], []>} : vector<16x4xf32>, vector<4x1xf32>, vector<16x1xf32> -> vector<16x1xf32>
    %c0_25 = arith.constant 0 : index
    %c0_26 = arith.constant 0 : index
    %43 = vector.load %arg2[%c0_25, %c0_26] : memref<16x1xf32, #tpu.memory_space<vmem>>, vector<16x1xf32>
    %44 = arith.subf %42, %43 : vector<16x1xf32>
    %cst_27 = arith.constant dense<0.000000e+00> : vector<32x1xf32>
    %45 = tpu.matmul %28, %42, %cst_27 {dimension_numbers = #tpu.dot_dimension_numbers<[1], [0], [0], [1], [0, 0, 1, 1], [], []>} : vector<32x16xf32>, vector<16x1xf32>, vector<32x1xf32> -> vector<32x1xf32>
    %c0_28 = arith.constant 0 : index
    %c0_29 = arith.constant 0 : index
    %46 = vector.load %arg3[%c0_28, %c0_29] : memref<32x1xf32, #tpu.memory_space<vmem>>, vector<32x1xf32>
    %47 = arith.subf %45, %46 : vector<32x1xf32>
    %c0_30 = arith.constant 0 : index
    %c0_31 = arith.constant 0 : index
    %48 = vector.load %arg20[%c0_30, %c0_31] : memref<1x16xf32, #tpu.memory_space<vmem>>, vector<1x16xf32>
    %49 = vector.broadcast %44 : vector<16x1xf32> to vector<16x16xf32>
    %50 = vector.broadcast %48 : vector<1x16xf32> to vector<16x16xf32>
    %51 = arith.mulf %49, %50 : vector<16x16xf32>
    %52 = math.sin %51 : vector<16x16xf32>
    %c0_32 = arith.constant 0 : index
    %c0_33 = arith.constant 0 : index
    %53 = vector.load %arg14[%c0_32, %c0_33] : memref<16x32xf32, #tpu.memory_space<vmem>>, vector<16x32xf32>
    %cst_34 = arith.constant dense<0.000000e+00> : vector<16x32xf32>
    %54 = tpu.matmul %52, %53, %cst_34 {dimension_numbers = #tpu.dot_dimension_numbers<[1], [0], [0], [1], [0, 0, 1, 1], [], []>} : vector<16x16xf32>, vector<16x32xf32>, vector<16x32xf32> -> vector<16x32xf32>
    %55 = math.cos %51 : vector<16x16xf32>
    %c0_35 = arith.constant 0 : index
    %c0_36 = arith.constant 0 : index
    %56 = vector.load %arg15[%c0_35, %c0_36] : memref<16x32xf32, #tpu.memory_space<vmem>>, vector<16x32xf32>
    %cst_37 = arith.constant dense<0.000000e+00> : vector<16x32xf32>
    %57 = tpu.matmul %55, %56, %cst_37 {dimension_numbers = #tpu.dot_dimension_numbers<[1], [0], [0], [1], [0, 0, 1, 1], [], []>} : vector<16x16xf32>, vector<16x32xf32>, vector<16x32xf32> -> vector<16x32xf32>
    %58 = arith.addf %54, %57 : vector<16x32xf32>
    %c0_38 = arith.constant 0 : index
    %c0_39 = arith.constant 0 : index
    %59 = vector.load %arg16[%c0_38, %c0_39] : memref<1x32xf32, #tpu.memory_space<vmem>>, vector<1x32xf32>
    %60 = vector.broadcast %59 : vector<1x32xf32> to vector<16x32xf32>
    %61 = arith.addf %58, %60 : vector<16x32xf32>
    %c0_40 = arith.constant 0 : index
    %c0_41 = arith.constant 0 : index
    %62 = vector.load %arg21[%c0_40, %c0_41] : memref<1x16xf32, #tpu.memory_space<vmem>>, vector<1x16xf32>
    %63 = vector.broadcast %47 : vector<32x1xf32> to vector<32x16xf32>
    %64 = vector.broadcast %62 : vector<1x16xf32> to vector<32x16xf32>
    %65 = arith.mulf %63, %64 : vector<32x16xf32>
    %66 = math.sin %65 : vector<32x16xf32>
    %c0_42 = arith.constant 0 : index
    %c0_43 = arith.constant 0 : index
    %67 = vector.load %arg17[%c0_42, %c0_43] : memref<16x32xf32, #tpu.memory_space<vmem>>, vector<16x32xf32>
    %cst_44 = arith.constant dense<0.000000e+00> : vector<32x32xf32>
    %68 = tpu.matmul %66, %67, %cst_44 {dimension_numbers = #tpu.dot_dimension_numbers<[1], [0], [0], [1], [0, 0, 1, 1], [], []>} : vector<32x16xf32>, vector<16x32xf32>, vector<32x32xf32> -> vector<32x32xf32>
    %69 = math.cos %65 : vector<32x16xf32>
    %c0_45 = arith.constant 0 : index
    %c0_46 = arith.constant 0 : index
    %70 = vector.load %arg18[%c0_45, %c0_46] : memref<16x32xf32, #tpu.memory_space<vmem>>, vector<16x32xf32>
    %cst_47 = arith.constant dense<0.000000e+00> : vector<32x32xf32>
    %71 = tpu.matmul %69, %70, %cst_47 {dimension_numbers = #tpu.dot_dimension_numbers<[1], [0], [0], [1], [0, 0, 1, 1], [], []>} : vector<32x16xf32>, vector<16x32xf32>, vector<32x32xf32> -> vector<32x32xf32>
    %72 = arith.addf %68, %71 : vector<32x32xf32>
    %c0_48 = arith.constant 0 : index
    %c0_49 = arith.constant 0 : index
    %73 = vector.load %arg19[%c0_48, %c0_49] : memref<1x32xf32, #tpu.memory_space<vmem>>, vector<1x32xf32>
    %74 = vector.broadcast %73 : vector<1x32xf32> to vector<32x32xf32>
    %75 = arith.addf %72, %74 : vector<32x32xf32>
    %c0_50 = arith.constant 0 : index
    %c0_51 = arith.constant 0 : index
    %76 = vector.load %arg22[%c0_50, %c0_51] : memref<64x32xf32, #tpu.memory_space<vmem>>, vector<64x32xf32>
    %cst_52 = arith.constant dense<0.000000e+00> : vector<16x32xf32>
    %77 = tpu.matmul %40, %76, %cst_52 {dimension_numbers = #tpu.dot_dimension_numbers<[1], [0], [0], [1], [0, 0, 1, 1], [], []>} : vector<16x64xf32>, vector<64x32xf32>, vector<16x32xf32> -> vector<16x32xf32>
    %78 = arith.addf %5, %61 : vector<16x32xf32>
    %79 = arith.addf %78, %77 : vector<16x32xf32>
    %80 = arith.addf %11, %75 : vector<32x32xf32>
    %cst_53 = arith.constant dense<0.000000e+00> : vector<16x16xf32>
    %81 = tpu.matmul %34, %23, %cst_53 {dimension_numbers = #tpu.dot_dimension_numbers<[1], [0], [0], [1], [0, 0, 1, 1], [], []>} : vector<16x32xf32>, vector<32x16xf32>, vector<16x16xf32> -> vector<16x16xf32>
    %82 = tpu.iota {dimensions = array<i32: 0>} : vector<16x16xi32>
    %83 = tpu.iota {dimensions = array<i32: 1>} : vector<16x16xi32>
    %84 = arith.cmpi eq, %82, %83 : vector<16x16xi32>
    %85 = arith.extui %84 : vector<16x16xi1> to vector<16x16xi32>
    %86 = arith.sitofp %85 : vector<16x16xi32> to vector<16x16xf32>
    %cst_54 = arith.constant 1.000000e+00 : f32
    %87 = vector.broadcast %cst_54 : f32 to vector<16x16xf32>
    %88 = arith.minimumf %81, %87 : vector<16x16xf32>
    %89 = arith.maximumf %88, %86 : vector<16x16xf32>
    %cst_55 = arith.constant 0.000000e+00 : f32
    %90 = vector.broadcast %cst_55 : f32 to vector<16x16xf32>
    %91 = arith.cmpf ogt, %89, %90 : vector<16x16xf32>
    %cst_56 = arith.constant 0.000000e+00 : f32
    %cst_57 = arith.constant -1.000000e+30 : f32
    %92 = vector.broadcast %cst_56 : f32 to vector<16x16xf32>
    %93 = vector.broadcast %cst_57 : f32 to vector<16x16xf32>
    %94 = arith.select %91, %92, %93 : vector<16x16xi1>, vector<16x16xf32>
    %c0_58 = arith.constant 0 : index
    %c0_59 = arith.constant 0 : index
    %c0_60 = arith.constant 0 : index
    %95 = vector.load %arg25[%c0_58, %c0_59, %c0_60] : memref<2x32x1xf32, #tpu.memory_space<vmem>>, vector<1x32x1xf32>
    %96 = vector.shape_cast %95 : vector<1x32x1xf32> to vector<32x1xf32>
    %cst_61 = arith.constant dense<0.000000e+00> : vector<32x1xf32>
    %97 = tpu.matmul %80, %96, %cst_61 {dimension_numbers = #tpu.dot_dimension_numbers<[1], [0], [0], [1], [0, 0, 1, 1], [], []>} : vector<32x32xf32>, vector<32x1xf32>, vector<32x1xf32> -> vector<32x1xf32>
    %98 = vector.broadcast %97 : vector<32x1xf32> to vector<32x16xf32>
    %99 = arith.mulf %98, %23 : vector<32x16xf32>
    %cst_62 = arith.constant dense<0.000000e+00> : vector<16x16xf32>
    %100 = tpu.matmul %34, %99, %cst_62 {dimension_numbers = #tpu.dot_dimension_numbers<[1], [0], [0], [1], [0, 0, 1, 1], [], []>} : vector<16x32xf32>, vector<32x16xf32>, vector<16x16xf32> -> vector<16x16xf32>
    %c0_63 = arith.constant 0 : index
    %c0_64 = arith.constant 0 : index
    %c0_65 = arith.constant 0 : index
    %101 = vector.load %arg23[%c0_63, %c0_64, %c0_65] : memref<2x32x32xf32, #tpu.memory_space<vmem>>, vector<1x32x32xf32>
    %102 = vector.shape_cast %101 : vector<1x32x32xf32> to vector<32x32xf32>
    %cst_66 = arith.constant dense<0.000000e+00> : vector<16x32xf32>
    %103 = tpu.matmul %79, %102, %cst_66 {dimension_numbers = #tpu.dot_dimension_numbers<[1], [0], [0], [1], [0, 0, 1, 1], [], []>} : vector<16x32xf32>, vector<32x32xf32>, vector<16x32xf32> -> vector<16x32xf32>
    %c0_67 = arith.constant 0 : index
    %c0_68 = arith.constant 0 : index
    %c0_69 = arith.constant 0 : index
    %104 = vector.load %arg24[%c0_67, %c0_68, %c0_69] : memref<2x32x2xf32, #tpu.memory_space<vmem>>, vector<1x32x2xf32>
    %105 = vector.shape_cast %104 : vector<1x32x2xf32> to vector<32x2xf32>
    %106 = vector.extract_strided_slice %105 {offsets = [0, 0], sizes = [32, 1], strides = [1, 1]} : vector<32x2xf32> to vector<32x1xf32>
    %cst_70 = arith.constant dense<0.000000e+00> : vector<16x1xf32>
    %107 = tpu.matmul %103, %106, %cst_70 {dimension_numbers = #tpu.dot_dimension_numbers<[1], [0], [0], [1], [0, 0, 1, 1], [], []>} : vector<16x32xf32>, vector<32x1xf32>, vector<16x1xf32> -> vector<16x1xf32>
    %108 = vector.extract_strided_slice %105 {offsets = [0, 1], sizes = [32, 1], strides = [1, 1]} : vector<32x2xf32> to vector<32x1xf32>
    %cst_71 = arith.constant dense<0.000000e+00> : vector<16x1xf32>
    %109 = tpu.matmul %103, %108, %cst_71 {dimension_numbers = #tpu.dot_dimension_numbers<[1], [0], [0], [1], [0, 0, 1, 1], [], []>} : vector<16x32xf32>, vector<32x1xf32>, vector<16x1xf32> -> vector<16x1xf32>
    %110 = tpu.transpose %109, [1, 0] : vector<16x1xf32> -> vector<1x16xf32>
    %111 = vector.broadcast %107 : vector<16x1xf32> to vector<16x16xf32>
    %112 = vector.broadcast %110 : vector<1x16xf32> to vector<16x16xf32>
    %113 = arith.addf %111, %112 : vector<16x16xf32>
    %114 = arith.addf %113, %100 : vector<16x16xf32>
    %cst_72 = arith.constant 0.000000e+00 : f32
    %115 = vector.broadcast %cst_72 : f32 to vector<16x16xf32>
    %116 = arith.cmpf ogt, %114, %115 : vector<16x16xf32>
    %cst_73 = arith.constant 2.000000e-01 : f32
    %117 = vector.broadcast %cst_73 : f32 to vector<16x16xf32>
    %118 = arith.mulf %117, %114 : vector<16x16xf32>
    %119 = arith.select %116, %114, %118 : vector<16x16xi1>, vector<16x16xf32>
    %120 = arith.addf %119, %94 : vector<16x16xf32>
    %cst_74 = arith.constant dense<0xFF800000> : vector<16xf32>
    %121 = vector.multi_reduction <maximumf>, %120, %cst_74 [1] : vector<16x16xf32> to vector<16xf32>
    %122 = vector.shape_cast %121 : vector<16xf32> to vector<16x1xf32>
    %123 = vector.broadcast %122 : vector<16x1xf32> to vector<16x16xf32>
    %124 = arith.subf %120, %123 : vector<16x16xf32>
    %125 = math.exp %124 : vector<16x16xf32>
    %cst_75 = arith.constant dense<0.000000e+00> : vector<16xf32>
    %126 = vector.multi_reduction <add>, %125, %cst_75 [1] : vector<16x16xf32> to vector<16xf32>
    %127 = vector.shape_cast %126 : vector<16xf32> to vector<16x1xf32>
    %128 = tpu.reciprocal %127 {approx = true} : vector<16x1xf32> -> vector<16x1xf32>
    %129 = vector.broadcast %128 : vector<16x1xf32> to vector<16x16xf32>
    %130 = arith.mulf %125, %129 : vector<16x16xf32>
    %cst_76 = arith.constant dense<0.000000e+00> : vector<16x32xf32>
    %131 = tpu.matmul %130, %103, %cst_76 {dimension_numbers = #tpu.dot_dimension_numbers<[1], [0], [0], [1], [0, 0, 1, 1], [], []>} : vector<16x16xf32>, vector<16x32xf32>, vector<16x32xf32> -> vector<16x32xf32>
    %c0_77 = arith.constant 0 : index
    %c0_78 = arith.constant 0 : index
    %c0_79 = arith.constant 0 : index
    %132 = vector.load %arg26[%c0_77, %c0_78, %c0_79] : memref<2x1x32xf32, #tpu.memory_space<vmem>>, vector<1x1x32xf32>
    %133 = vector.shape_cast %132 : vector<1x1x32xf32> to vector<1x32xf32>
    %134 = vector.broadcast %133 : vector<1x32xf32> to vector<16x32xf32>
    %135 = arith.addf %131, %134 : vector<16x32xf32>
    %cst_80 = arith.constant 0.000000e+00 : f32
    %136 = vector.broadcast %cst_80 : f32 to vector<16x32xf32>
    %137 = arith.maximumf %135, %136 : vector<16x32xf32>
    %c1 = arith.constant 1 : index
    %c0_81 = arith.constant 0 : index
    %c0_82 = arith.constant 0 : index
    %138 = vector.load %arg25[%c1, %c0_81, %c0_82] : memref<2x32x1xf32, #tpu.memory_space<vmem>>, vector<1x32x1xf32>
    %139 = vector.shape_cast %138 : vector<1x32x1xf32> to vector<32x1xf32>
    %cst_83 = arith.constant dense<0.000000e+00> : vector<32x1xf32>
    %140 = tpu.matmul %80, %139, %cst_83 {dimension_numbers = #tpu.dot_dimension_numbers<[1], [0], [0], [1], [0, 0, 1, 1], [], []>} : vector<32x32xf32>, vector<32x1xf32>, vector<32x1xf32> -> vector<32x1xf32>
    %141 = vector.broadcast %140 : vector<32x1xf32> to vector<32x16xf32>
    %142 = arith.mulf %141, %23 : vector<32x16xf32>
    %cst_84 = arith.constant dense<0.000000e+00> : vector<16x16xf32>
    %143 = tpu.matmul %34, %142, %cst_84 {dimension_numbers = #tpu.dot_dimension_numbers<[1], [0], [0], [1], [0, 0, 1, 1], [], []>} : vector<16x32xf32>, vector<32x16xf32>, vector<16x16xf32> -> vector<16x16xf32>
    %c1_85 = arith.constant 1 : index
    %c0_86 = arith.constant 0 : index
    %c0_87 = arith.constant 0 : index
    %144 = vector.load %arg23[%c1_85, %c0_86, %c0_87] : memref<2x32x32xf32, #tpu.memory_space<vmem>>, vector<1x32x32xf32>
    %145 = vector.shape_cast %144 : vector<1x32x32xf32> to vector<32x32xf32>
    %cst_88 = arith.constant dense<0.000000e+00> : vector<16x32xf32>
    %146 = tpu.matmul %137, %145, %cst_88 {dimension_numbers = #tpu.dot_dimension_numbers<[1], [0], [0], [1], [0, 0, 1, 1], [], []>} : vector<16x32xf32>, vector<32x32xf32>, vector<16x32xf32> -> vector<16x32xf32>
    %c1_89 = arith.constant 1 : index
    %c0_90 = arith.constant 0 : index
    %c0_91 = arith.constant 0 : index
    %147 = vector.load %arg24[%c1_89, %c0_90, %c0_91] : memref<2x32x2xf32, #tpu.memory_space<vmem>>, vector<1x32x2xf32>
    %148 = vector.shape_cast %147 : vector<1x32x2xf32> to vector<32x2xf32>
    %149 = vector.extract_strided_slice %148 {offsets = [0, 0], sizes = [32, 1], strides = [1, 1]} : vector<32x2xf32> to vector<32x1xf32>
    %cst_92 = arith.constant dense<0.000000e+00> : vector<16x1xf32>
    %150 = tpu.matmul %146, %149, %cst_92 {dimension_numbers = #tpu.dot_dimension_numbers<[1], [0], [0], [1], [0, 0, 1, 1], [], []>} : vector<16x32xf32>, vector<32x1xf32>, vector<16x1xf32> -> vector<16x1xf32>
    %151 = vector.extract_strided_slice %148 {offsets = [0, 1], sizes = [32, 1], strides = [1, 1]} : vector<32x2xf32> to vector<32x1xf32>
    %cst_93 = arith.constant dense<0.000000e+00> : vector<16x1xf32>
    %152 = tpu.matmul %146, %151, %cst_93 {dimension_numbers = #tpu.dot_dimension_numbers<[1], [0], [0], [1], [0, 0, 1, 1], [], []>} : vector<16x32xf32>, vector<32x1xf32>, vector<16x1xf32> -> vector<16x1xf32>
    %153 = tpu.transpose %152, [1, 0] : vector<16x1xf32> -> vector<1x16xf32>
    %154 = vector.broadcast %150 : vector<16x1xf32> to vector<16x16xf32>
    %155 = vector.broadcast %153 : vector<1x16xf32> to vector<16x16xf32>
    %156 = arith.addf %154, %155 : vector<16x16xf32>
    %157 = arith.addf %156, %143 : vector<16x16xf32>
    %cst_94 = arith.constant 0.000000e+00 : f32
    %158 = vector.broadcast %cst_94 : f32 to vector<16x16xf32>
    %159 = arith.cmpf ogt, %157, %158 : vector<16x16xf32>
    %cst_95 = arith.constant 2.000000e-01 : f32
    %160 = vector.broadcast %cst_95 : f32 to vector<16x16xf32>
    %161 = arith.mulf %160, %157 : vector<16x16xf32>
    %162 = arith.select %159, %157, %161 : vector<16x16xi1>, vector<16x16xf32>
    %163 = arith.addf %162, %94 : vector<16x16xf32>
    %cst_96 = arith.constant dense<0xFF800000> : vector<16xf32>
    %164 = vector.multi_reduction <maximumf>, %163, %cst_96 [1] : vector<16x16xf32> to vector<16xf32>
    %165 = vector.shape_cast %164 : vector<16xf32> to vector<16x1xf32>
    %166 = vector.broadcast %165 : vector<16x1xf32> to vector<16x16xf32>
    %167 = arith.subf %163, %166 : vector<16x16xf32>
    %168 = math.exp %167 : vector<16x16xf32>
    %cst_97 = arith.constant dense<0.000000e+00> : vector<16xf32>
    %169 = vector.multi_reduction <add>, %168, %cst_97 [1] : vector<16x16xf32> to vector<16xf32>
    %170 = vector.shape_cast %169 : vector<16xf32> to vector<16x1xf32>
    %171 = tpu.reciprocal %170 {approx = true} : vector<16x1xf32> -> vector<16x1xf32>
    %172 = vector.broadcast %171 : vector<16x1xf32> to vector<16x16xf32>
    %173 = arith.mulf %168, %172 : vector<16x16xf32>
    %cst_98 = arith.constant dense<0.000000e+00> : vector<16x32xf32>
    %174 = tpu.matmul %173, %146, %cst_98 {dimension_numbers = #tpu.dot_dimension_numbers<[1], [0], [0], [1], [0, 0, 1, 1], [], []>} : vector<16x16xf32>, vector<16x32xf32>, vector<16x32xf32> -> vector<16x32xf32>
    %c1_99 = arith.constant 1 : index
    %c0_100 = arith.constant 0 : index
    %c0_101 = arith.constant 0 : index
    %175 = vector.load %arg26[%c1_99, %c0_100, %c0_101] : memref<2x1x32xf32, #tpu.memory_space<vmem>>, vector<1x1x32xf32>
    %176 = vector.shape_cast %175 : vector<1x1x32xf32> to vector<1x32xf32>
    %177 = vector.broadcast %176 : vector<1x32xf32> to vector<16x32xf32>
    %178 = arith.addf %174, %177 : vector<16x32xf32>
    %179 = vector.extract_strided_slice %178 {offsets = [0, 0], sizes = [4, 32], strides = [1, 1]} : vector<16x32xf32> to vector<4x32xf32>
    %c0_102 = arith.constant 0 : index
    %c0_103 = arith.constant 0 : index
    %180 = vector.load %arg27[%c0_102, %c0_103] : memref<32x1xf32, #tpu.memory_space<vmem>>, vector<32x1xf32>
    %cst_104 = arith.constant dense<0.000000e+00> : vector<4x1xf32>
    %181 = tpu.matmul %179, %180, %cst_104 {dimension_numbers = #tpu.dot_dimension_numbers<[1], [0], [0], [1], [0, 0, 1, 1], [], []>} : vector<4x32xf32>, vector<32x1xf32>, vector<4x1xf32> -> vector<4x1xf32>
    %c0_105 = arith.constant 0 : index
    %c0_106 = arith.constant 0 : index
    %182 = vector.load %arg28[%c0_105, %c0_106] : memref<1x1xf32, #tpu.memory_space<vmem>>, vector<1x1xf32>
    %183 = vector.broadcast %182 : vector<1x1xf32> to vector<4x1xf32>
    %184 = arith.addf %181, %183 : vector<4x1xf32>
    %cst_107 = arith.constant 0.000000e+00 : f32
    %185 = vector.broadcast %cst_107 : f32 to vector<4x1xf32>
    %186 = arith.subf %185, %184 : vector<4x1xf32>
    %187 = math.exp %186 : vector<4x1xf32>
    %cst_108 = arith.constant 1.000000e+00 : f32
    %188 = vector.broadcast %cst_108 : f32 to vector<4x1xf32>
    %189 = arith.addf %188, %187 : vector<4x1xf32>
    %cst_109 = arith.constant 1.000000e+00 : f32
    %190 = vector.broadcast %cst_109 : f32 to vector<4x1xf32>
    %191 = arith.divf %190, %189 : vector<4x1xf32>
    %c0_110 = arith.constant 0 : index
    %c0_111 = arith.constant 0 : index
    %192 = vector.load %arg29[%c0_110, %c0_111] : memref<4x1xf32, #tpu.memory_space<vmem>>, vector<4x1xf32>
    tpu.vector_store %arg29[%c0_110, %c0_111], %191 {strides = array<i32>} : memref<4x1xf32, #tpu.memory_space<vmem>>, vector<4x1xf32>,
    return
  }
}

</mosaic_0001>

<bundles_post_ra>
// kernel: model_forward.1
= control target key start
LH: loop header
LB: loop body
LE: loop exit
PB: predicated region body
PF: predicated region fallthrough
CT: control target
= control target key end

     0   :  { %v4497_v0 = vmov 0   ;;  %s4498_s3 = smov 5   ;;  %s4499_s7 = smov 4   ;;  %vm438_vm0 = vcmask 1043456   ;;  %v330_v8 = vlaneseq  ;;  %vm431_vm1 = vcmask 31744   ;;  %s5381_s0 = inlined_call_operand.smem [shape: u32[30], index: -1, kind: input, shape index: {}] }
   0x1   :  { %4451 = vset.pattern.permute.xlu0 %v4497_v0  ;;  %s3848_s6 = sld [smem:[%s5381_s0 + %s4498_s3]]   ;;  %4452 = vset.pattern.permute.xlu1 %v4497_v0  ;;  %s4500_s11 = smov 8   ;;  %v4501_v11 = vmov 0.0   ;;  %vm521_vm5 = vcmask 130048   ;;  %vm134_vm9 = vcmask 64512   ;;  %vm241_vm10 = vcmask 1045504  }
   0x2   :  { %s3847_s10 = sld [smem:[%s5381_s0 + %s4499_s7]]   ;;  %v4553_v9 = vand.u32 127, %v330_v8  ;;  %s4502_s15 = smov 2   ;;  %vm228_vm11 = vcmask 48128   ;;  %v4509_v63 = vmov 683565275  }
   0x3   :  { %s3851_s14 = sld [smem:[%s5381_s0 + %s4500_s11]]   ;;  %s4503_s19 = smov 10  }
   0x4   :  { %s3845_s18 = sld [smem:[%s5381_s0 + %s4502_s15]]   ;;  %s4504_s26 = smov 12  }
   0x5   :  { %s3853_s22 = sld [smem:[%s5381_s0 + %s4503_s19]]   ;;  %s4505_s30 = smov 1  }
   0x6   :  { %s1_s25 = sld [smem:[%s5381_s0]]   ;;  %s4506_s4 = smov 15  }
   0x7   :  { %v332_v1 = vld [vmem:[%s3848_s6] sm:$0xff]  ;;  %v333_v2 = vld [vmem:[%s3848_s6 + $0x8] sm:$0xff]  ;;  %s3855_s29 = sld [smem:[%s5381_s0 + %s4504_s26]]   ;;  %s4507_s8 = smov 14  }
   0x8   :  { %335 = vperm.xlu0 %4451, %v332_v1   ;;  %v430_v3 = vld [vmem:[%s3847_s10] sm:$0xf]  ;;  %s3844_s3 = sld [smem:[%s5381_s0 + %s4505_s30]]   ;;  %s4508_s12 = smov 20  }
   0x9   :  { %4166 = vmatprep.subr.msk.mxu0 %vm438_vm0, %v430_v3  ;;  %v376_v4 = vld [vmem:[%s3851_s14 + $0x10] sm:$0xff]  ;;  %v374_v5 = vld [vmem:[%s3851_s14] sm:$0xff]  ;;  %v375_v6 = vld [vmem:[%s3851_s14 + $0x8] sm:$0xff]  ;;  %s3858_s7 = sld [smem:[%s5381_s0 + %s4506_s4]]   ;;  %s4515_s16 = smov 3  }
   0xa   :  { %4167 = vmatpush3.msk.msra.mxu0 %vm438_vm0, %v430_v3  ;;  %379 = vperm.xlu1 %4452, %v374_v5   ;;  %v377_v7 = vld [vmem:[%s3851_s14 + $0x18] sm:$0xff]  ;;  %v518_v18 = vld [vmem:[%s3845_s18 + $0x8] sm:$0xff]  ;;  %v517_v21 = vld [vmem:[%s3845_s18] sm:$0xff]  ;;  %s4595_s11 = sld [smem:[%s5381_s0 + %s4507_s8]]   ;;  %s4516_s20 = smov 6  }
   0xb   :  { %v126_v29 = vld [vmem:[%s3853_s22] sm:$0xff]  ;;  %s3863_s15 = sld [smem:[%s5381_s0 + %s4508_s12]]   ;;  %s4517_s24 = smov 7  }
   0xc   :  { %338 = vperm.xlu0 %4451, %v333_v2   ;;  %4153 = vmatprep.subr.mxu1 %v126_v29  ;;  %v124_v30 = vld [vmem:[%s1_s25] sm:$0xff]  ;;  %v125_v31 = vld [vmem:[%s1_s25 + $0x8] sm:$0xff]  ;;  %v4510_v2 = vmov 2475754826   ;;  %s4682_s19 = sld [smem:[%s5381_s0 + %s4515_s16]]   ;;  %s4518_s28 = smov 17  }
   0xd   :  { %4154 = vmatpush3.msra.mxu1 %v126_v29  ;;  %4155 = vmatprep.mubr.msk.f32.mxu1 %vm134_vm9, %v124_v30  ;;  %v220_v32 = vld [vmem:[%s3855_s29] sm:$0x3f]  ;;  %s4702_s23 = sld [smem:[%s5381_s0 + %s4516_s20]]   ;;  %s4519_s2 = smov 21  }
   0xe   :  { %382 = vperm.xlu1 %4452, %v375_v6   ;;  %4156 = vmatmul.mubr.msk.f32.vlgmr.msra.gmra.mxu1 %vm134_vm9, %v125_v31  ;;  %v216_v33 = vld [vmem:[%s3844_s3] sm:$0xff]  ;;  %v217_v34 = vld [vmem:[%s3844_s3 + $0x8] sm:$0xff]  ;;  %v218_v35 = vld [vmem:[%s3844_s3 + $0x10] sm:$0xff]  ;;  %v4512_v6 = vmov 2102212464   ;;  %s4711_s27 = sld [smem:[%s5381_s0 + %s4517_s24]]   ;;  %s4520_s6 = smov 18  }
   0xf   :  { %4158 = vmatprep.subr.msk.mxu1 %vm241_vm10, %v220_v32  ;;  %4160 = vmatprep.mubr.msk.f32.mxu1 %vm228_vm11, %v216_v33  ;;  %v1063_v36 = vld [vmem:[%s3858_s7 + $0x8] sm:$0xff]  ;;  %v1062_v37 = vld [vmem:[%s3858_s7] sm:$0xff]  ;;  %v219_v38 = vld [vmem:[%s3844_s3 + $0x18] sm:$0xff]  ;;  %s3860_s1 = sld [smem:[%s5381_s0 + %s4518_s28]]   ;;  %s4521_s10 = smov 22  }
  0x10   :  { %385 = vperm.xlu0 %4451, %v376_v4   ;;  %4159 = vmatpush3.msk.msra.mxu1 %vm241_vm10, %v220_v32  ;;  %v4599_v39 = vld [vmem:[%s4595_s11 + $0x8] sm:$0xff]  ;;  %v4511_v4 = vmov 2131351028   ;;  %s3864_s5 = sld [smem:[%s5381_s0 + %s4519_s2]]   ;;  %s4523_s14 = smov 9  }
  0x11   :  { %4181 = vmatprep.subr.mxu1 %v1063_v36  ;;  %v3904_v40 = vld [vmem:[%s3863_s15] ss:$0 sm:$0xff]  ;;  %s3861_s9 = sld [smem:[%s5381_s0 + %s4520_s6]]   ;;  %s4524_s18 = smov 25  }
  0x12   :  { %388 = vperm.xlu1 %4452, %v377_v7   ;;  %4161 = vmatmul.mubr.msk.f32.vlgmr.msra.gmra.mxu1 %vm228_vm11, %v217_v34  ;;  %s4768_s13 = sld [smem:[%s5381_s0 + %s4521_s10]]   ;;  %s4525_s22 = smov 23  }
  0x13   :  { %4163 = vmatprep.mubr.msk.f32.mxu1 %vm228_vm11, %v218_v35  ;;  %4182 = vmatpush3.msra.mxu1 %v1063_v36  ;;  %s3852_s17 = sld [smem:[%s5381_s0 + %s4523_s14]]   ;;  %s4526_s26 = smov 19  }
  0x14   :  { %4183 = vmatprep.subr.mxu1 %v1062_v37  ;;  %s5163_s21 = sld [smem:[%s5381_s0 + %s4524_s18]]   ;;  %s4527_s30 = smov 13  }
  0x15   :  { %4184 = vmatpush3.msra.mxu1 %v1062_v37  ;;  %s5189_s25 = sld [smem:[%s5381_s0 + %s4525_s22]]   ;;  %s4528_s4 = smov 11  }
  0x16   :  { %4164 = vmatmul.mubr.msk.f32.gmra.mxu1 %vm228_vm11, %v219_v38  ;;  %4188 = vmatprep.subr.mxu1 %v4599_v39  ;;  %s3862_s29 = sld [smem:[%s5381_s0 + %s4526_s26]]   ;;  %s4529_s8 = smov 16  }
  0x17   :  { %s3856_s3 = sld [smem:[%s5381_s0 + %s4527_s30]]   ;;  %s4530_s12 = smov 24  }
  0x18   :  { %s3854_s7 = sld [smem:[%s5381_s0 + %s4528_s4]]   ;;  %s4531_s16 = smov 127  }
  0x19   :  { %s5232_s15 = sld [smem:[%s5381_s0 + %s4530_s12]]  }
  0x83   :  { %v336_v10 = vpop.permute.xlu0 %335 }
  0x84   :  { %vm340_vm2 = vcmp.eq.s32.totalorder %v336_v10, %v4553_v9  ;;  %v4513_v10 = vmov 920167782  }
  0x85   :  { %v3882_v12 = vsel %vm340_vm2, 1.0, %v4501_v11  ;;  %v380_v15 = vpop.permute.xlu1 %379 }
  0x86   :  { %4168 = vmatprep.mubr.msk.f32.mxu0 %vm431_vm1, %v3882_v12  ;;  %vm390_vm4 = vcmp.eq.s32.totalorder %v380_v15, %v4553_v9 }
  0x87   :  { %v339_v13 = vpop.permute.xlu0 %338  ;;  %v3888_v16 = vsel %vm390_vm4, 1.0, %v4501_v11 }
  0x88   :  { %vm341_vm3 = vcmp.eq.s32.totalorder %v339_v13, %v4553_v9 }
  0x89   :  { %v3883_v14 = vsel %vm341_vm3, 1.0, %v4501_v11  ;;  %v383_v17 = vpop.permute.xlu1 %382 }
  0x8a   :  { %4169 = vmatmul.mubr.msk.f32.vlgmr.msra.gmra.mxu0 %vm431_vm1, %v3883_v14  ;;  %vm391_vm6 = vcmp.eq.s32.totalorder %v383_v17, %v4553_v9 }
  0x8b   :  { %4175 = vmatprep.mubr.msk.f32.mxu0 %vm521_vm5, %v3888_v16  ;;  %v386_v19 = vpop.permute.xlu0 %385  ;;  %v3889_v26 = vsel %vm391_vm6, 1.0, %v4501_v11 }
  0x8c   :  { %vm392_vm7 = vcmp.eq.s32.totalorder %v386_v19, %v4553_v9 }
  0x8d   :  { %v389_v23 = vpop.permute.xlu1 %388  ;;  %v3890_v27 = vsel %vm392_vm7, 1.0, %v4501_v11 }
  0x8e   :  { %vm393_vm8 = vcmp.eq.s32.totalorder %v389_v23, %v4553_v9 }
  0x8f   :  { %v3891_v28 = vsel %vm393_vm8, 1.0, %v4501_v11 }
 0x14a   :  { %v4170_v20 = vpop.f32.mrf.mxu0 }
 0x14b   :  { %v520_v22 = vsub.f32 %v4170_v20, %v518_v18  ;;  %4171 = vmatprep.subr.mxu0 %v4170_v20  ;;  %v4514_v18 = vmov 1326507024  }
 0x14c   :  { %v508_v24 = vpop.f32.mrf.mxu0  ;;  %4172 = vmatpush3.msra.mxu0 %v4170_v20 }
 0x14d   :  { %v519_v25 = vsub.f32 %v508_v24, %v517_v21  ;;  %4173 = vmatprep.subr.mxu0 %v508_v24  ;;  %635 = vperm.xlu1 %4452, %v520_v22  }
 0x14e   :  { %4174 = vmatpush3.msra.mxu0 %v508_v24 }
 0x14f   :  { %4176 = vmatmul.mubr.msk.f32.vlgmr.msra.gmra.mxu0 %vm521_vm5, %v3889_v26  ;;  %630 = vperm.xlu0 %4451, %v519_v25  }
 0x150   :  { %4178 = vmatprep.mubr.msk.f32.mxu0 %vm521_vm5, %v3890_v27 }
 0x153   :  { %4179 = vmatmul.mubr.msk.f32.gmra.mxu0 %vm521_vm5, %v3891_v28 }
 0x1c8   :  { %v636_v41 = vpop.permute.xlu1 %635 }
 0x1c9   :  { %v4605_v42 = vmul.f32 %v3904_v40, %v636_v41 }
 0x1ca   :  { %v631_v43 = vpop.permute.xlu0 %630 }
 0x1cb   :  { %v750_v44 = vand.u32 2147483647, %v4605_v42  ;;  %v753_v45 = vand.u32 2139095040, %v4605_v42  ;;  %v4609_v46 = vmul.f32 %v3904_v40, %v631_v43  ;;  %vm752_vm11 = vcmp.lt.s32.totalorder %v4605_v42, 0 }
 0x1cd   :  { %v754_v47 = vshrl.u32 %v753_v45, 23  ;;  %v757_v48 = vand.u32 8388607, %v750_v44  ;;  %v649_v49 = vand.u32 2139095040, %v4609_v46  ;;  %v646_v51 = vand.u32 2147483647, %v4609_v46 }
 0x1cf   :  { %v3909_v50 = vadd.s32 4294967169, %v754_v47  ;;  %v650_v52 = vshrl.u32 %v649_v49, 23  ;;  %v758_v54 = vor.u32 8388608, %v757_v48  ;;  %v653_v56 = vand.u32 8388607, %v646_v51 }
 0x1d1   :  { %v760_v53 = vadd.s32 1, %v3909_v50  ;;  %v3905_v55 = vadd.s32 4294967169, %v650_v52  ;;  %v4617_v61 = vshll.u32 %v758_v54, 8  ;;  %v654_v1 = vor.u32 8388608, %v653_v56 }
 0x1d3   :  { %vm761_vm12 = vcmp.gt.s32.totalorder %v760_v53, 0  ;;  %v656_v58 = vadd.s32 1, %v3905_v55  ;;  %v694_v37 = vshll.u32 %v654_v1, 8 }
 0x1d4   :  { %v762_v57 = vsel %vm761_vm12, %v760_v53, 0  ;;  %vm4690_vm12 = vcmp.le.f32.partialorder %v750_v44, 0.7853982 }
 0x1d5   :  { %v763_v59 = vshrl.u32 %v762_v57, 5  ;;  %v764_v60 = vand.u32 31, %v762_v57  ;;  %vm657_vm13 = vcmp.gt.s32.totalorder %v656_v58, 0 }
 0x1d6   :  { %v658_v23 = vsel %vm657_vm13, %v656_v58, 0  ;;  %vm648_vm13 = vcmp.lt.s32.totalorder %v4609_v46, 0 }
 0x1d7   :  { %v765_v62 = vsub.s32 32, %v764_v60  ;;  %v767_v0 = vshll.u32 %v4509_v63, %v764_v60  ;;  %v770_v3 = vshll.u32 %v4510_v2, %v764_v60  ;;  %v773_v5 = vshll.u32 %v4511_v4, %v764_v60 }
 0x1d8   :  { %v776_v7 = vshll.u32 %v4512_v6, %v764_v60  ;;  %v779_v12 = vshll.u32 %v4513_v10, %v764_v60  ;;  %vm782_vm14 = vcmp.lt.s32.totalorder %v763_v59, 1  ;;  %vm784_vm15 = vcmp.lt.s32.totalorder %v763_v59, 3 }
 0x1d9   :  { %v768_v13 = vshrl.u32 %v4510_v2, %v765_v62  ;;  %v771_v14 = vshrl.u32 %v4511_v4, %v765_v62  ;;  %v774_v15 = vshrl.u32 %v4512_v6, %v765_v62  ;;  %v766_v16 = vshrl.u32 %v4509_v63, %v765_v62 }
 0x1da   :  { %v777_v17 = vshrl.u32 %v4513_v10, %v765_v62  ;;  %v780_v19 = vshrl.u32 %v4514_v18, %v765_v62  ;;  %vm785_vm0 = vcmp.lt.s32.totalorder %v763_v59, 4  ;;  %v660_v26 = vand.u32 31, %v658_v23 }
 0x1db   :  { %v769_v20 = vor.u32 %v768_v13, %v767_v0  ;;  %v772_v21 = vor.u32 %v771_v14, %v770_v3  ;;  %v775_v22 = vor.u32 %v774_v15, %v773_v5  ;;  %vm783_vm1 = vcmp.lt.s32.totalorder %v763_v59, 2 }
 0x1dc   :  { %v778_v24 = vor.u32 %v777_v17, %v776_v7  ;;  %v781_v25 = vor.u32 %v780_v19, %v779_v12  ;;  %v661_v34 = vsub.s32 32, %v660_v26  ;;  %v659_v43 = vshrl.u32 %v658_v23, 5 }
 0x1dd   :  { %v786_v27 = vsel %vm782_vm14, %v766_v16, %v769_v20  ;;  %v787_v28 = vsel %vm785_vm0, %v775_v22, 2102212464  ;;  %v790_v29 = vsel %vm782_vm14, %v769_v20, %v772_v21  ;;  %v794_v30 = vsel %vm782_vm14, %v772_v21, %v775_v22 }
 0x1de   :  { %v788_v31 = vsel %vm784_vm15, %v772_v21, %v787_v28  ;;  %v791_v32 = vsel %vm785_vm0, %v778_v24, 920167782  ;;  %v795_v33 = vsel %vm785_vm0, %v781_v25, 1326507024  ;;  %v663_v50 = vshll.u32 %v4509_v63, %v660_v26 }
 0x1df   :  { %v792_v35 = vsel %vm784_vm15, %v775_v22, %v791_v32  ;;  %v796_v36 = vsel %vm784_vm15, %v778_v24, %v795_v33  ;;  %v789_v38 = vsel %vm783_vm1, %v786_v27, %v788_v31  ;;  %v664_v52 = vshrl.u32 %v4510_v2, %v661_v34 }
 0x1e0   :  { %v793_v40 = vsel %vm783_vm1, %v790_v29, %v792_v35  ;;  %v797_v41 = vsel %vm783_vm1, %v794_v30, %v796_v36  ;;  %v666_v53 = vshll.u32 %v4510_v2, %v660_v26  ;;  %v667_v54 = vshrl.u32 %v4511_v4, %v661_v34 }
 0x1e1   :  { %v4638_v45 = vmul.u32.u64.low %v4617_v61, %v797_v41  ;;  %v4639_v47 = vmul.u32.u64.high %v4617_v61, %v797_v41, %v4638_v45  ;;  %v4642_v48 = vmul.u32.u64.low %v4617_v61, %v793_v40  ;;  %v4643_v49 = vmul.u32.u64.high %v4617_v61, %v793_v40, %v4642_v48 }
 0x1e2   :  { %v669_v55 = vshll.u32 %v4511_v4, %v660_v26  ;;  %v670_v56 = vshrl.u32 %v4512_v6, %v661_v34  ;;  %v672_v57 = vshll.u32 %v4512_v6, %v660_v26  ;;  %v673_v58 = vshrl.u32 %v4513_v10, %v661_v34 }
 0x1e3   :  { %v665_v59 = vor.u32 %v664_v52, %v663_v50  ;;  %v668_v60 = vor.u32 %v667_v54, %v666_v53  ;;  %v675_v62 = vshll.u32 %v4513_v10, %v660_v26  ;;  %v676_v0 = vshrl.u32 %v4514_v18, %v661_v34 }
 0x1e4   :  { %v805_v1 = vmul.u32 %v4617_v61, %v789_v38  ;;  %vm807_vm2 = vc.u32 %v4639_v47, %v4642_v48  ;;  %v808_v3 = vadd.s32 1, %v4643_v49  ;;  %v671_v5 = vor.u32 %v670_v56, %v669_v55 }
 0x1e5   :  { %v662_v7 = vshrl.u32 %v4509_v63, %v661_v34  ;;  %v674_v12 = vor.u32 %v673_v58, %v672_v57  ;;  %v677_v13 = vor.u32 %v676_v0, %v675_v62  ;;  %vm678_vm3 = vcmp.lt.s32.totalorder %v659_v43, 1 }
 0x1e6   :  { %v809_v14 = vsel %vm807_vm2, %v808_v3, %v4643_v49  ;;  %vm680_vm4 = vcmp.lt.s32.totalorder %v659_v43, 3  ;;  %vm681_vm6 = vcmp.lt.s32.totalorder %v659_v43, 4  ;;  %v686_v15 = vsel %vm678_vm3, %v665_v59, %v668_v60 }
 0x1e7   :  { %v810_v16 = vadd.s32 %v809_v14, %v805_v1  ;;  %v683_v17 = vsel %vm681_vm6, %v671_v5, 2102212464  ;;  %v687_v19 = vsel %vm681_vm6, %v674_v12, 920167782  ;;  %v690_v61 = vsel %vm678_vm3, %v668_v60, %v671_v5 }
 0x1e8   :  { %vm679_vm7 = vcmp.lt.s32.totalorder %v659_v43, 2  ;;  %v682_v20 = vsel %vm678_vm3, %v662_v7, %v665_v59  ;;  %v688_v21 = vsel %vm680_vm4, %v671_v5, %v687_v19  ;;  %v691_v22 = vsel %vm681_vm6, %v677_v13, 1326507024 }
 0x1e9   :  { %v811_v23 = vadd.s32 536870912, %v810_v16  ;;  %v684_v24 = vsel %vm680_vm4, %v668_v60, %v683_v17  ;;  %v689_v25 = vsel %vm679_vm7, %v686_v15, %v688_v21  ;;  %v692_v26 = vsel %vm680_vm4, %v674_v12, %v691_v22 }
 0x1ea   :  { %v693_v27 = vsel %vm679_vm7, %v690_v61, %v692_v26  ;;  %v4662_v28 = vmul.u32.u64.low %v694_v37, %v689_v25  ;;  %v4663_v29 = vmul.u32.u64.high %v694_v37, %v689_v25, %v4662_v28  ;;  %v685_v33 = vsel %vm679_vm7, %v682_v20, %v684_v24 }
 0x1eb   :  { %v4665_v30 = vshrl.u32 %v811_v23, 30  ;;  %v4667_v31 = vmul.u32.u64.low %v694_v37, %v693_v27  ;;  %v4668_v32 = vmul.u32.u64.high %v694_v37, %v693_v27, %v4667_v31  ;;  %v701_v38 = vmul.u32 %v694_v37, %v685_v33 }
 0x1ec   :  { %v704_v35 = vadd.s32 1, %v4663_v29  ;;  %v806_v37 = vadd.s32 %v4642_v48, %v4639_v47  ;;  %vm4716_vm14 = vcmp.le.f32.partialorder %v646_v51, 0.7853982  ;;  %vm738_vm15 = vweird.f32 %v4609_v46 }
 0x1ed   :  { %v813_v34 = vshll.u32 %v4665_v30, 30  ;;  %vm703_vm8 = vc.u32 %v4668_v32, %v4662_v28  ;;  %v702_v48 = vadd.s32 %v4662_v28, %v4668_v32 }
 0x1ee   :  { %v705_v40 = vsel %vm703_vm8, %v704_v35, %v4663_v29  ;;  %v620_v29 = vld [vmem:[%s4682_s19 + $0x8] sm:$0xff] }
 0x1ef   :  { %v814_v36 = vsub.s32 %v810_v16, %v813_v34  ;;  %v706_v43 = vadd.s32 %v705_v40, %v701_v38  ;;  %v619_v34 = vld [vmem:[%s4682_s19] sm:$0xff]  ;;  %v622_v40 = vld [vmem:[%s4682_s19 + $0x18] sm:$0xff] }
 0x1f1   :  { %v816_v41 = vsub.s32 0, %v814_v36  ;;  %v707_v49 = vadd.s32 536870912, %v706_v43 }
 0x1f3   :  { %v3910_v45 = vmin.u32 %v816_v41, %v814_v36  ;;  %v4674_v52 = vshrl.u32 %v707_v49, 30  ;;  %v621_v49 = vld [vmem:[%s4682_s19 + $0x10] sm:$0xff] }
 0x1f5   :  { %v818_v50 = vclz %v3910_v45  ;;  %v709_v54 = vshll.u32 %v4674_v52, 30 }
 0x1f7   :  { %v3911_v53 = vadd.s32 4294967294, %v818_v50  ;;  %v710_v55 = vsub.s32 %v706_v43, %v709_v54  ;;  %v732_v50 = vsub.s32 4, %v4674_v52 }
 0x1f9   :  { %vm3912_vm9 = vcmp.lt.s32.totalorder %v3911_v53, 0  ;;  %v712_v59 = vsub.s32 0, %v710_v55 }
 0x1fa   :  { %v821_v56 = vsel %vm3912_vm9, 0, %v3911_v53 }
 0x1fb   :  { %v822_v57 = vsub.s32 32, %v821_v56  ;;  %v826_v58 = vsub.s32 4294967266, %v821_v56  ;;  %v823_v60 = vshll.u32 %v814_v36, %v821_v56  ;;  %v3906_v1 = vmin.u32 %v712_v59, %v710_v55 }
 0x1fc   :  { %v836_v36 = vsub.s32 4, %v4665_v30  ;;  %v733_v59 = vsel %vm648_vm13, %v732_v50, %v4674_v52  ;;  %v346_v52 = vld [vmem:[%s4711_s27] sm:$0xff] }
 0x1fd   :  { %v824_v62 = vshrl.u32 %v806_v37, %v822_v57  ;;  %v827_v0 = vadd.s32 127, %v826_v58  ;;  %v714_v7 = vclz %v3906_v1  ;;  %v417_v58 = vld [vmem:[%s4702_s23 + $0x8] sm:$0xff]  ;;  %v2096_v50 = vld [vmem:[%s3861_s9] sm:$0xff] }
 0x1fe   :  { %v837_v56 = vsel %vm752_vm11, %v836_v36, %v4665_v30  ;;  %v416_v30 = vld [vmem:[%s4702_s23] sm:$0xff] }
 0x1ff   :  { %v825_v3 = vor.u32 %v824_v62, %v823_v60  ;;  %v828_v5 = vshll.u32 %v827_v0, 23  ;;  %v3907_v13 = vadd.s32 4294967294, %v714_v7  ;;  %v839_v60 = vsel %vm4690_vm12, 0, %v837_v56  ;;  %v348_v0 = vld [vmem:[%s4711_s27 + $0x10] sm:$0xff]  ;;  %v349_v7 = vld [vmem:[%s4711_s27 + $0x18] sm:$0xff] }
 0x200   :  { %v735_v62 = vsel %vm4716_vm14, 0, %v733_v59  ;;  %v843_v1 = vadd.s32 3, %v839_v60 }
 0x201   :  { %v829_v12 = vor.u32 4788187, %v828_v5  ;;  %v832_v15 = vcvt.s32.f32 %v825_v3  ;;  %vm3908_vm10 = vcmp.lt.s32.totalorder %v3907_v13, 0 }
 0x202   :  { %v717_v16 = vsel %vm3908_vm10, 0, %v3907_v13  ;;  %v1052_v13 = vand.u32 3, %v839_v60 }
 0x203   :  { %v830_v14 = vand.u32 2147483647, %v829_v12  ;;  %v718_v17 = vsub.s32 32, %v717_v16  ;;  %v722_v19 = vsub.s32 4294967266, %v717_v16  ;;  %v719_v20 = vshll.u32 %v710_v55, %v717_v16 }
 0x204   :  { %v739_v12 = vadd.s32 3, %v735_v62  ;;  %vm1053_vm0 = vcmp.lt.s32.totalorder %v1052_v13, 2  ;;  %vm1054_vm1 = vcmp.eq.s32.totalorder %v1052_v13, 0  ;;  %vm1057_vm2 = vcmp.eq.s32.totalorder %v1052_v13, 2 }
 0x205   :  { %v833_v47 = vmul.f32 %v832_v15, %v830_v14  ;;  %v720_v21 = vshrl.u32 %v702_v48, %v718_v17  ;;  %v723_v22 = vadd.s32 127, %v722_v19  ;;  %v844_v14 = vand.u32 3, %v843_v1  ;;  %v347_v17 = vld [vmem:[%s4711_s27 + $0x8] sm:$0xff] }
 0x206   :  { %v740_v48 = vand.u32 3, %v739_v12 }
 0x207   :  { %v834_v61 = vxor.u32 2147483648, %v833_v47  ;;  %v721_v24 = vor.u32 %v720_v21, %v719_v20  ;;  %v724_v25 = vshll.u32 %v723_v22, 23  ;;  %vm846_vm3 = vcmp.eq.s32.totalorder %v844_v14, 0 }
 0x208   :  { %vm849_vm4 = vcmp.eq.s32.totalorder %v844_v14, 2  ;;  %vm745_vm8 = vcmp.eq.s32.totalorder %v740_v48, 2  ;;  %vm742_vm10 = vcmp.eq.s32.totalorder %v740_v48, 0 }
 0x209   :  { %v835_v23 = vsel %vm752_vm11, %v834_v61, %v833_v47  ;;  %v725_v28 = vor.u32 4788187, %v724_v25  ;;  %v728_v32 = vcvt.s32.f32 %v721_v24  ;;  %v949_v47 = vand.u32 3, %v735_v62 }
 0x20a   :  { %v838_v27 = vsel %vm4690_vm12, %v4605_v42, %v835_v23  ;;  %vm741_vm11 = vcmp.lt.s32.totalorder %v740_v48, 2  ;;  %vm842_vm12 = vweird.f32 %v4605_v42  ;;  %v1683_v42 = vld [vmem:[%s3860_s1 + $0x8] sm:$0xff] }
 0x20b   :  { %v726_v31 = vand.u32 2147483647, %v725_v28  ;;  %4453 = vcosq.f32 %v838_v27  ;;  %vm950_vm6 = vcmp.lt.s32.totalorder %v949_v47, 2  ;;  %vm954_vm7 = vcmp.eq.s32.totalorder %v949_v47, 2 }
 0x20c   :  { %4455 = vsinq.f32 %v838_v27  ;;  %vm951_vm9 = vcmp.eq.s32.totalorder %v949_v47, 0 }
 0x20d   :  { %v729_v44 = vmul.f32 %v728_v32, %v726_v31 }
 0x20f   :  { %v4177_v33 = vpop.f32.mrf.mxu0  ;;  %v730_v41 = vxor.u32 2147483648, %v729_v44 }
 0x210   :  { %v624_v35 = vsub.f32 %v4177_v33, %v620_v29 }
 0x211   :  { %v600_v38 = vpop.f32.mrf.mxu0  ;;  %v731_v54 = vsel %vm648_vm13, %v730_v41, %v729_v44  ;;  %vm845_vm13 = vcmp.lt.s32.totalorder %v844_v14, 2 }
 0x212   :  { %v623_v43 = vsub.f32 %v600_v38, %v619_v34  ;;  %1243 = vperm.xlu1 %4452, %v624_v35   ;;  %v734_v37 = vsel %vm4716_vm14, %v4609_v46, %v731_v54  ;;  %v854_v35 = vld [vmem:[%s4595_s11] sm:$0xff]  ;;  %s3859_s11 = sld [smem:[%s5381_s0 + %s4529_s8]]  }
 0x213   :  { %v4180_v45 = vpop.f32.mrf.mxu0  ;;  %4457 = vcosq.f32 %v734_v37  ;;  %v1682_v46 = vld [vmem:[%s3860_s1] sm:$0xff] }
 0x214   :  { %v626_v55 = vsub.f32 %v4180_v45, %v622_v40  ;;  %1238 = vperm.xlu0 %4451, %v623_v43   ;;  %4459 = vsinq.f32 %v734_v37  ;;  %v4777_v37 = vld [vmem:[%s4768_s13 + $0x38] sm:$0xff] }
 0x215   :  { %v610_v57 = vpop.f32.mrf.mxu0 }
 0x216   :  { %v625_v51 = vsub.f32 %v610_v57, %v621_v49  ;;  %1253 = vperm.xlu1 %4452, %v626_v55   ;;  %v2097_v49 = vld [vmem:[%s3861_s9 + $0x8] sm:$0xff] }
 0x217   :  { %4195 = vmatprep.subr.mxu0 %v2097_v49 }
 0x218   :  { %1248 = vperm.xlu0 %4451, %v625_v51   ;;  %v4454_v3 = vpop.eup %4453  ;;  %4196 = vmatpush3.msra.mxu0 %v2097_v49 }
 0x219   :  { %v4456_v5 = vpop.eup %4455  ;;  %v850_v16 = vxor.u32 2147483648, %v4454_v3  ;;  %4197 = vmatprep.subr.mxu0 %v2096_v50 }
 0x21a   :  { %422 = vperm.xlu1 %4452, %v417_v58   ;;  %v847_v15 = vxor.u32 2147483648, %v4456_v5  ;;  %4198 = vmatpush3.msra.mxu0 %v2096_v50 }
 0x21b   :  { %v1059_v22 = vsel %vm1057_vm2, %v850_v16, %v4456_v5  ;;  %v851_v33 = vsel %vm849_vm4, %v850_v16, %v4456_v5  ;;  %4215 = vmatprep.subr.mxu0 %v4777_v37 }
 0x21c   :  { %419 = vperm.xlu0 %4451, %v416_v30   ;;  %v1056_v21 = vsel %vm1054_vm1, %v4454_v3, %v847_v15  ;;  %v848_v32 = vsel %vm846_vm3, %v4454_v3, %v847_v15 }
 0x21d   :  { %v1060_v27 = vsel %vm1053_vm0, %v1056_v21, %v1059_v22  ;;  %v852_v38 = vsel %vm845_vm13, %v848_v32, %v851_v33 }
 0x21e   :  { %357 = vperm.xlu1 %4452, %v348_v0   ;;  %v1061_v44 = vsel %vm842_vm12, nan, %v1060_v27  ;;  %v853_v40 = vsel %vm842_vm12, nan, %v852_v38 }
 0x220   :  { %360 = vperm.xlu0 %4451, %v349_v7   ;;  %v4458_v19 = vpop.eup %4457 }
 0x221   :  { %v4460_v61 = vpop.eup %4459  ;;  %v746_v20 = vxor.u32 2147483648, %v4458_v19 }
 0x222   :  { %351 = vperm.xlu1 %4452, %v346_v52   ;;  %v743_v23 = vxor.u32 2147483648, %v4460_v61 }
 0x223   :  { %v956_v24 = vsel %vm954_vm7, %v746_v20, %v4460_v61  ;;  %v747_v25 = vsel %vm745_vm8, %v746_v20, %v4460_v61 }
 0x224   :  { %354 = vperm.xlu0 %4451, %v347_v17   ;;  %v953_v26 = vsel %vm951_vm9, %v4458_v19, %v743_v23  ;;  %v744_v28 = vsel %vm742_vm10, %v4458_v19, %v743_v23 }
 0x225   :  { %v957_v29 = vsel %vm950_vm6, %v953_v26, %v956_v24  ;;  %v748_v31 = vsel %vm741_vm11, %v744_v28, %v747_v25 }
 0x226   :  { %v958_v34 = vsel %vm738_vm15, nan, %v957_v29  ;;  %v749_v36 = vsel %vm738_vm15, nan, %v748_v31 }
 0x227   :  { %4185 = vmatprep.mubr.msk.f32.mxu1 %vm521_vm5, %v958_v34 }
 0x228   :  { %4186 = vmatmul.mubr.msk.f32.vlgmr.msra.gmra.mxu1 %vm521_vm5, %v1061_v44 }
 0x229   :  { %4189 = vmatpush3.msra.mxu1 %v4599_v39  ;;  %4192 = vmatprep.mubr.msk.f32.mxu1 %vm521_vm5, %v749_v36  ;;  %v3926_v39 = vld [vmem:[%s3864_s5] ss:$0 sm:$0xff] }
 0x22a   :  { %4190 = vmatprep.subr.mxu1 %v854_v35 }
 0x22b   :  { %4191 = vmatpush3.msra.mxu1 %v854_v35 }
 0x22c   :  { %4193 = vmatmul.mubr.msk.f32.vlgmr.msra.gmra.mxu1 %vm521_vm5, %v853_v40  ;;  %4205 = vmatprep.subr.mxu1 %v1683_v42 }
 0x22d   :  { %4206 = vmatpush3.msra.mxu1 %v1683_v42 }
 0x22e   :  { %4207 = vmatprep.subr.mxu1 %v1682_v46 }
 0x22f   :  { %4208 = vmatpush3.msra.mxu1 %v1682_v46 }
 0x28d   :  { %v1244_v41 = vpop.permute.xlu1 %1243 }
 0x28e   :  { %v4770_v43 = vmul.f32 %v3926_v39, %v1244_v41 }
 0x28f   :  { %v1239_v45 = vpop.permute.xlu0 %1238 }
 0x290   :  { %v1370_v53 = vand.u32 2147483647, %v4770_v43  ;;  %v1373_v54 = vand.u32 2139095040, %v4770_v43  ;;  %v4774_v55 = vmul.f32 %v3926_v39, %v1239_v45 }
 0x291   :  { %v1254_v56 = vpop.permute.xlu1 %1253 }
 0x292   :  { %v1374_v57 = vshrl.u32 %v1373_v54, 23  ;;  %v1377_v51 = vand.u32 8388607, %v1370_v53  ;;  %v1266_v58 = vand.u32 2147483647, %v4774_v55  ;;  %v1269_v59 = vand.u32 2139095040, %v4774_v55 }
 0x293   :  { %v4783_v60 = vmul.f32 %v3926_v39, %v1254_v56  ;;  %v1249_v62 = vpop.permute.xlu0 %1248 }
 0x294   :  { %v3931_v30 = vadd.s32 4294967169, %v1374_v57  ;;  %v1270_v0 = vshrl.u32 %v1269_v59, 23  ;;  %v1273_v1 = vand.u32 8388607, %v1266_v58  ;;  %v1378_v3 = vor.u32 8388608, %v1377_v51 }
 0x295   :  { %v1578_v7 = vand.u32 2147483647, %v4783_v60  ;;  %v1581_v12 = vand.u32 2139095040, %v4783_v60  ;;  %v4790_v14 = vmul.f32 %v3926_v39, %v1249_v62 }
 0x296   :  { %v1380_v5 = vadd.s32 1, %v3931_v30  ;;  %v3927_v13 = vadd.s32 4294967169, %v1270_v0  ;;  %v1274_v52 = vor.u32 8388608, %v1273_v1  ;;  %v4796_v61 = vshll.u32 %v1378_v3, 8 }
 0x297   :  { %v1582_v15 = vshrl.u32 %v1581_v12, 23  ;;  %v4794_v16 = vand.u32 8388607, %v1578_v7  ;;  %v1474_v23 = vand.u32 2147483647, %v4790_v14 }
 0x298   :  { %vm1381_vm14 = vcmp.gt.s32.totalorder %v1380_v5, 0  ;;  %v1276_v48 = vadd.s32 1, %v3927_v13  ;;  %v4798_v20 = vshll.u32 %v1274_v52, 8 }
 0x299   :  { %v1382_v47 = vsel %vm1381_vm14, %v1380_v5, 0  ;;  %v4800_v21 = vadd.s32 4294967169, %v1582_v15  ;;  %v1586_v22 = vor.u32 8388608, %v4794_v16 }
 0x29a   :  { %v1383_v17 = vshrl.u32 %v1382_v47, 5  ;;  %v1384_v19 = vand.u32 31, %v1382_v47  ;;  %vm1277_vm15 = vcmp.gt.s32.totalorder %v1276_v48, 0 }
 0x29b   :  { %v1278_v42 = vsel %vm1277_vm15, %v1276_v48, 0 }
 0x29c   :  { %v1385_v24 = vsub.s32 32, %v1384_v19  ;;  %v1387_v25 = vshll.u32 %v4509_v63, %v1384_v19  ;;  %v1390_v26 = vshll.u32 %v4510_v2, %v1384_v19  ;;  %v1393_v27 = vshll.u32 %v4511_v4, %v1384_v19 }
 0x29d   :  { %v1396_v28 = vshll.u32 %v4512_v6, %v1384_v19  ;;  %v1399_v29 = vshll.u32 %v4513_v10, %v1384_v19  ;;  %vm1402_vm0 = vcmp.lt.s32.totalorder %v1383_v17, 1  ;;  %vm1403_vm1 = vcmp.lt.s32.totalorder %v1383_v17, 2 }
 0x29e   :  { %v1388_v31 = vshrl.u32 %v4510_v2, %v1385_v24  ;;  %v1391_v32 = vshrl.u32 %v4511_v4, %v1385_v24  ;;  %v1394_v33 = vshrl.u32 %v4512_v6, %v1385_v24  ;;  %v1386_v34 = vshrl.u32 %v4509_v63, %v1385_v24 }
 0x29f   :  { %v1397_v44 = vshrl.u32 %v4513_v10, %v1385_v24  ;;  %v1400_v35 = vshrl.u32 %v4514_v18, %v1385_v24  ;;  %vm1404_vm2 = vcmp.lt.s32.totalorder %v1383_v17, 3  ;;  %vm1405_vm3 = vcmp.lt.s32.totalorder %v1383_v17, 4 }
 0x2a0   :  { %v1389_v36 = vor.u32 %v1388_v31, %v1387_v25  ;;  %v1392_v38 = vor.u32 %v1391_v32, %v1390_v26  ;;  %v1395_v40 = vor.u32 %v1394_v33, %v1393_v27  ;;  %v1280_v41 = vand.u32 31, %v1278_v42 }
 0x2a1   :  { %v1398_v46 = vor.u32 %v1397_v44, %v1396_v28  ;;  %v1401_v39 = vor.u32 %v1400_v35, %v1399_v29  ;;  %v1279_v1 = vshrl.u32 %v1278_v42, 5 }
 0x2a2   :  { %v1406_v45 = vsel %vm1402_vm0, %v1386_v34, %v1389_v36  ;;  %v1407_v49 = vsel %vm1405_vm3, %v1395_v40, 2102212464  ;;  %v1410_v50 = vsel %vm1402_vm0, %v1389_v36, %v1392_v38  ;;  %v1414_v54 = vsel %vm1402_vm0, %v1392_v38, %v1395_v40 }
 0x2a3   :  { %v1408_v56 = vsel %vm1404_vm2, %v1392_v38, %v1407_v49  ;;  %v1411_v57 = vsel %vm1405_vm3, %v1398_v46, 920167782  ;;  %v1415_v51 = vsel %vm1405_vm3, %v1401_v39, 1326507024  ;;  %v1281_v59 = vsub.s32 32, %v1280_v41 }
 0x2a4   :  { %v1409_v30 = vsel %vm1403_vm1, %v1406_v45, %v1408_v56  ;;  %v1412_v62 = vsel %vm1404_vm2, %v1395_v40, %v1411_v57  ;;  %v1416_v0 = vsel %vm1404_vm2, %v1398_v46, %v1415_v51  ;;  %v1283_v13 = vshll.u32 %v4509_v63, %v1280_v41 }
 0x2a5   :  { %v1413_v3 = vsel %vm1403_vm1, %v1410_v50, %v1412_v62  ;;  %v1417_v5 = vsel %vm1403_vm1, %v1414_v54, %v1416_v0  ;;  %v1425_v12 = vmul.u32 %v4796_v61, %v1409_v30  ;;  %v1282_v19 = vshrl.u32 %v4509_v63, %v1281_v59 }
 0x2a6   :  { %v4828_v52 = vmul.u32.u64.low %v4796_v61, %v1417_v5  ;;  %v4829_v15 = vmul.u32.u64.high %v4796_v61, %v1417_v5, %v4828_v52  ;;  %v4832_v47 = vmul.u32.u64.low %v4796_v61, %v1413_v3  ;;  %v4833_v48 = vmul.u32.u64.high %v4796_v61, %v1413_v3, %v4832_v47 }
 0x2a7   :  { %v1284_v24 = vshrl.u32 %v4510_v2, %v1281_v59  ;;  %v1286_v25 = vshll.u32 %v4510_v2, %v1280_v41  ;;  %v1287_v17 = vshrl.u32 %v4511_v4, %v1281_v59  ;;  %v1289_v26 = vshll.u32 %v4511_v4, %v1280_v41 }
 0x2a8   :  { %v1290_v27 = vshrl.u32 %v4512_v6, %v1281_v59  ;;  %v1292_v28 = vshll.u32 %v4512_v6, %v1280_v41  ;;  %v1293_v29 = vshrl.u32 %v4513_v10, %v1281_v59  ;;  %v1295_v61 = vshll.u32 %v4513_v10, %v1280_v41 }
 0x2a9   :  { %v1285_v31 = vor.u32 %v1284_v24, %v1283_v13  ;;  %v1288_v32 = vor.u32 %v1287_v17, %v1286_v25  ;;  %v1296_v33 = vshrl.u32 %v4514_v18, %v1281_v59  ;;  %vm1427_vm4 = vc.u32 %v4829_v15, %v4832_v47 }
 0x2aa   :  { %v1428_v34 = vadd.s32 1, %v4833_v48  ;;  %v1291_v44 = vor.u32 %v1290_v27, %v1289_v26  ;;  %vm1298_vm6 = vcmp.lt.s32.totalorder %v1279_v1, 1  ;;  %v1294_v35 = vor.u32 %v1293_v29, %v1292_v28 }
 0x2ab   :  { %v1297_v36 = vor.u32 %v1296_v33, %v1295_v61  ;;  %vm1299_vm7 = vcmp.lt.s32.totalorder %v1279_v1, 2  ;;  %vm1300_vm8 = vcmp.lt.s32.totalorder %v1279_v1, 3  ;;  %vm1301_vm9 = vcmp.lt.s32.totalorder %v1279_v1, 4 }
 0x2ac   :  { %v1429_v38 = vsel %vm1427_vm4, %v1428_v34, %v4833_v48  ;;  %v1302_v40 = vsel %vm1298_vm6, %v1282_v19, %v1285_v31  ;;  %v1306_v42 = vsel %vm1298_vm6, %v1285_v31, %v1288_v32  ;;  %v1303_v39 = vsel %vm1301_vm9, %v1291_v44, 2102212464 }
 0x2ad   :  { %v1430_v46 = vadd.s32 %v1429_v38, %v1425_v12  ;;  %v1307_v41 = vsel %vm1301_vm9, %v1294_v35, 920167782  ;;  %v1310_v45 = vsel %vm1298_vm6, %v1288_v32, %v1291_v44  ;;  %v1304_v49 = vsel %vm1300_vm8, %v1288_v32, %v1303_v39 }
 0x2ae   :  { %v1308_v50 = vsel %vm1300_vm8, %v1291_v44, %v1307_v41  ;;  %v1311_v54 = vsel %vm1301_vm9, %v1297_v36, 1326507024  ;;  %v1588_v56 = vadd.s32 1, %v4800_v21  ;;  %v1477_v30 = vand.u32 2139095040, %v4790_v14 }
 0x2af   :  { %v1431_v57 = vadd.s32 536870912, %v1430_v46  ;;  %v1309_v51 = vsel %vm1299_vm7, %v1306_v42, %v1308_v50  ;;  %v1312_v59 = vsel %vm1300_vm8, %v1294_v35, %v1311_v54  ;;  %v1305_v62 = vsel %vm1299_vm7, %v1302_v40, %v1304_v49 }
 0x2b0   :  { %v1313_v0 = vsel %vm1299_vm7, %v1310_v45, %v1312_v59  ;;  %v4854_v3 = vmul.u32.u64.low %v4798_v20, %v1309_v51  ;;  %v4855_v5 = vmul.u32.u64.high %v4798_v20, %v1309_v51, %v4854_v3  ;;  %vm1589_vm10 = vcmp.gt.s32.totalorder %v1588_v56, 0 }
 0x2b1   :  { %v4858_v12 = vshrl.u32 %v1431_v57, 30  ;;  %v4861_v13 = vmul.u32.u64.low %v4798_v20, %v1313_v0  ;;  %v4862_v21 = vmul.u32.u64.high %v4798_v20, %v1313_v0, %v4861_v13  ;;  %v1590_v52 = vsel %vm1589_vm10, %v1588_v56, 0 }
 0x2b2   :  { %v4866_v48 = vand.u32 8388607, %v1474_v23  ;;  %v1592_v19 = vand.u32 31, %v1590_v52  ;;  %v1426_v24 = vadd.s32 %v4832_v47, %v4829_v15  ;;  %v1321_v25 = vmul.u32 %v4798_v20, %v1305_v62  ;;  %v4903_v62 = vpop.permute.xlu0 %419 }
 0x2b3   :  { %v1433_v1 = vshll.u32 %v4858_v12, 30  ;;  %v1324_v17 = vadd.s32 1, %v4855_v5  ;;  %vm1323_vm11 = vc.u32 %v4862_v21, %v4854_v3  ;;  %v4878_v27 = vshll.u32 %v1586_v22, 8 }
 0x2b4   :  { %v1478_v28 = vshrl.u32 %v1477_v30, 23  ;;  %v4881_v31 = vshrl.u32 %v1590_v52, 5  ;;  %v1593_v32 = vsub.s32 32, %v1592_v19  ;;  %v1482_v15 = vor.u32 8388608, %v4866_v48 }
 0x2b5   :  { %v4872_v26 = vsub.s32 %v1430_v46, %v1433_v1  ;;  %v1325_v29 = vsel %vm1323_vm11, %v1324_v17, %v4855_v5  ;;  %v1595_v61 = vshll.u32 %v4509_v63, %v1592_v19  ;;  %v1598_v33 = vshll.u32 %v4510_v2, %v1592_v19 }
 0x2b6   :  { %v1326_v47 = vadd.s32 %v1325_v29, %v1321_v25  ;;  %v1596_v34 = vshrl.u32 %v4510_v2, %v1593_v32  ;;  %v1599_v16 = vshrl.u32 %v4511_v4, %v1593_v32  ;;  %v1601_v22 = vshll.u32 %v4511_v4, %v1592_v19 }
 0x2b7   :  { %v1436_v20 = vsub.s32 0, %v4872_v26  ;;  %v1602_v44 = vshrl.u32 %v4512_v6, %v1593_v32  ;;  %v1604_v38 = vshll.u32 %v4512_v6, %v1592_v19  ;;  %v1605_v40 = vshrl.u32 %v4513_v10, %v1593_v32 }
 0x2b8   :  { %v1327_v36 = vadd.s32 536870912, %v1326_v47  ;;  %v1597_v42 = vor.u32 %v1596_v34, %v1595_v61  ;;  %v1600_v46 = vor.u32 %v1599_v16, %v1598_v33  ;;  %v1607_v41 = vshll.u32 %v4513_v10, %v1592_v19 }
 0x2b9   :  { %v3932_v35 = vmin.u32 %v1436_v20, %v4872_v26  ;;  %v1603_v39 = vor.u32 %v1602_v44, %v1601_v22  ;;  %v1606_v50 = vor.u32 %v1605_v40, %v1604_v38  ;;  %v1608_v54 = vshrl.u32 %v4514_v18, %v1593_v32  ;;  %v4932_v40 = vpop.permute.xlu0 %360 }
 0x2ba   :  { %v4895_v49 = vshrl.u32 %v1327_v36, 30  ;;  %v1594_v56 = vshrl.u32 %v4509_v63, %v1593_v32  ;;  %vm1610_vm12 = vcmp.lt.s32.totalorder %v4881_v31, 1  ;;  %vm1611_vm13 = vcmp.lt.s32.totalorder %v4881_v31, 2 }
 0x2bb   :  { %v1438_v45 = vclz %v3932_v35  ;;  %v3935_v57 = vadd.s32 4294967169, %v1478_v28  ;;  %v1609_v30 = vor.u32 %v1608_v54, %v1607_v41  ;;  %vm1613_vm14 = vcmp.lt.s32.totalorder %v4881_v31, 4 }
 0x2bc   :  { %v1329_v59 = vshll.u32 %v4895_v49, 30  ;;  %vm1612_vm15 = vcmp.lt.s32.totalorder %v4881_v31, 3  ;;  %v1615_v0 = vsel %vm1613_vm14, %v1603_v39, 2102212464  ;;  %v1618_v5 = vsel %vm1610_vm12, %v1597_v42, %v1600_v46 }
 0x2bd   :  { %v3933_v51 = vadd.s32 4294967294, %v1438_v45  ;;  %v1619_v13 = vsel %vm1613_vm14, %v1606_v50, 920167782  ;;  %v1614_v1 = vsel %vm1610_vm12, %v1594_v56, %v1597_v42  ;;  %v1622_v28 = vsel %vm1610_vm12, %v1600_v46, %v1603_v39 }
 0x2be   :  { %v4908_v52 = vsub.s32 %v1326_v47, %v1329_v59  ;;  %v1620_v19 = vsel %vm1612_vm15, %v1603_v39, %v1619_v13  ;;  %v1623_v29 = vsel %vm1613_vm14, %v1609_v30, 1326507024  ;;  %v1616_v47 = vsel %vm1612_vm15, %v1600_v46, %v1615_v0 }
 0x2bf   :  { %vm3934_vm0 = vcmp.lt.s32.totalorder %v3933_v51, 0  ;;  %v1621_v17 = vsel %vm1611_vm13, %v1618_v5, %v1620_v19  ;;  %v1624_v34 = vsel %vm1612_vm15, %v1606_v50, %v1623_v29  ;;  %v1456_v42 = vsub.s32 4, %v4858_v12 }
 0x2c0   :  { %v1441_v25 = vsel %vm3934_vm0, 0, %v3933_v51  ;;  %v1332_v61 = vsub.s32 0, %v4908_v52  ;;  %v4925_v16 = vmul.u32.u64.low %v4878_v27, %v1621_v17  ;;  %v4926_v22 = vmul.u32.u64.high %v4878_v27, %v1621_v17, %v4925_v16 }
 0x2c1   :  { %v1442_v32 = vsub.s32 32, %v1441_v25  ;;  %v1446_v20 = vsub.s32 4294967266, %v1441_v25  ;;  %v1443_v33 = vshll.u32 %v4872_v26, %v1441_v25  ;;  %v1625_v38 = vsel %vm1611_vm13, %v1622_v28, %v1624_v34 }
 0x2c2   :  { %v3928_v36 = vmin.u32 %v1332_v61, %v4908_v52  ;;  %v4936_v26 = vmul.u32.u64.low %v4878_v27, %v1625_v38  ;;  %v4937_v46 = vmul.u32.u64.high %v4878_v27, %v1625_v38, %v4936_v26  ;;  %v1484_v39 = vadd.s32 1, %v3935_v57 }
 0x2c3   :  { %v1444_v44 = vshrl.u32 %v1426_v24, %v1442_v32  ;;  %v1447_v35 = vadd.s32 127, %v1446_v20  ;;  %v1617_v24 = vsel %vm1611_vm13, %v1614_v1, %v1616_v47  ;;  %vm1372_vm1 = vcmp.lt.s32.totalorder %v4770_v43, 0 }
 0x2c4   :  { %v1334_v50 = vclz %v3928_v36  ;;  %v1636_v54 = vadd.s32 1, %v4926_v22  ;;  %vm1485_vm2 = vcmp.gt.s32.totalorder %v1484_v39, 0  ;;  %vm365_vm3 = vcmp.eq.s32.totalorder %v4932_v40, %v4553_v9 }
 0x2c5   :  { %v1445_v41 = vor.u32 %v1444_v44, %v1443_v33  ;;  %v1448_v45 = vshll.u32 %v1447_v35, 23  ;;  %vm4947_vm4 = vcmp.le.f32.partialorder %v1370_v53, 0.7853982  ;;  %v1486_v59 = vsel %vm1485_vm2, %v1484_v39, 0 }
 0x2c6   :  { %v3929_v51 = vadd.s32 4294967294, %v1334_v50  ;;  %v4953_v31 = vshll.u32 %v1482_v15, 8  ;;  %v4522_v30 = vmov 1.0   ;;  %v4962_v53 = vsel %vm1372_vm1, %v1456_v42, %v4858_v12 }
 0x2c7   :  { %v1449_v57 = vor.u32 4788187, %v1448_v45  ;;  %4234 = vmatprep.subr.msk.mxu1 %vm365_vm3, %v4522_v30  ;;  %v1633_v0 = vmul.u32 %v4878_v27, %v1617_v24  ;;  %vm1635_vm6 = vc.u32 %v4937_v46, %v4925_v16  ;;  %v1488_v5 = vand.u32 31, %v1486_v59 }
 0x2c8   :  { %v1452_v15 = vcvt.s32.f32 %v1445_v41  ;;  %vm3930_vm7 = vcmp.lt.s32.totalorder %v3929_v51, 0  ;;  %v1637_v13 = vsel %vm1635_vm6, %v1636_v54, %v4926_v22  ;;  %v1322_v1 = vadd.s32 %v4854_v3, %v4862_v21 }
 0x2c9   :  { %v1450_v48 = vand.u32 2147483647, %v1449_v57  ;;  %v1337_v19 = vsel %vm3930_vm7, 0, %v3929_v51  ;;  %v1638_v25 = vadd.s32 %v1637_v13, %v1633_v0  ;;  %v1489_v17 = vsub.s32 32, %v1488_v5 }
 0x2ca   :  { %v1338_v12 = vsub.s32 32, %v1337_v19  ;;  %v1342_v29 = vsub.s32 4294967266, %v1337_v19  ;;  %v4970_v32 = vshrl.u32 %v1486_v59, 5  ;;  %v1339_v27 = vshll.u32 %v4908_v52, %v1337_v19 }
 0x2cb   :  { %v1453_v28 = vmul.f32 %v1452_v15, %v1450_v48  ;;  %v1639_v20 = vadd.s32 536870912, %v1638_v25  ;;  %v1491_v61 = vshll.u32 %v4509_v63, %v1488_v5  ;;  %v1492_v47 = vshrl.u32 %v4510_v2, %v1489_v17 }
 0x2cc   :  { %v1340_v34 = vshrl.u32 %v1322_v1, %v1338_v12  ;;  %v1343_v22 = vadd.s32 127, %v1342_v29  ;;  %v1495_v3 = vshrl.u32 %v4511_v4, %v1489_v17  ;;  %v1490_v44 = vshrl.u32 %v4509_v63, %v1489_v17 }
 0x2cd   :  { %v1454_v33 = vxor.u32 2147483648, %v1453_v28  ;;  %v4976_v21 = vshrl.u32 %v1639_v20, 30  ;;  %v1494_v35 = vshll.u32 %v4510_v2, %v1488_v5  ;;  %v1498_v36 = vshrl.u32 %v4512_v6, %v1489_v17 }
 0x2ce   :  { %v1341_v38 = vor.u32 %v1340_v34, %v1339_v27  ;;  %v1344_v42 = vshll.u32 %v1343_v22, 23  ;;  %v1497_v26 = vshll.u32 %v4511_v4, %v1488_v5  ;;  %vm1268_vm8 = vcmp.lt.s32.totalorder %v4774_v55, 0 }
 0x2cf   :  { %v1455_v52 = vsel %vm1372_vm1, %v1454_v33, %v1453_v28  ;;  %v1641_v41 = vshll.u32 %v4976_v21, 30  ;;  %v1493_v63 = vor.u32 %v1492_v47, %v1491_v61  ;;  %v1496_v45 = vor.u32 %v1495_v3, %v1494_v35 }
 0x2d0   :  { %v1458_v39 = vsel %vm4947_vm4, %v4770_v43, %v1455_v52  ;;  %vm4991_vm9 = vcmp.le.f32.partialorder %v1266_v58, 0.7853982  ;;  %v1345_v50 = vor.u32 4788187, %v1344_v42  ;;  %v1499_v24 = vor.u32 %v1498_v36, %v1497_v26 }
 0x2d1   :  { %v1500_v4 = vshll.u32 %v4512_v6, %v1488_v5  ;;  %v1501_v54 = vshrl.u32 %v4513_v10, %v1489_v17  ;;  %4461 = vcosq.f32 %v1458_v39  ;;  %v4997_v57 = vsub.s32 %v1638_v25, %v1641_v41 }
 0x2d2   :  { %v1503_v51 = vshll.u32 %v4513_v10, %v1488_v5  ;;  %v1504_v59 = vshrl.u32 %v4514_v18, %v1489_v17  ;;  %4463 = vsinq.f32 %v1458_v39  ;;  %v1346_v0 = vand.u32 2147483647, %v1345_v50 }
 0x2d3   :  { %v1348_v48 = vcvt.s32.f32 %v1341_v38  ;;  %v1502_v58 = vor.u32 %v1501_v54, %v1500_v4  ;;  %v1644_v15 = vsub.s32 0, %v4997_v57  ;;  %vm1506_vm10 = vcmp.lt.s32.totalorder %v4970_v32, 1 }
 0x2d4   :  { %v1505_v13 = vor.u32 %v1504_v59, %v1503_v51  ;;  %vm1509_vm11 = vcmp.lt.s32.totalorder %v4970_v32, 4  ;;  %vm1507_vm12 = vcmp.lt.s32.totalorder %v4970_v32, 2  ;;  %v1514_v19 = vsel %vm1506_vm10, %v1493_v63, %v1496_v45 }
 0x2d5   :  { %v1349_v6 = vmul.f32 %v1348_v48, %v1346_v0  ;;  %v1511_v1 = vsel %vm1509_vm11, %v1499_v24, 2102212464  ;;  %v3940_v10 = vmin.u32 %v1644_v15, %v4997_v57  ;;  %vm1508_vm13 = vcmp.lt.s32.totalorder %v4970_v32, 3 }
 0x2d6   :  { %v1515_v18 = vsel %vm1509_vm11, %v1502_v58, 920167782  ;;  %v1518_v5 = vsel %vm1506_vm10, %v1496_v45, %v1499_v24  ;;  %v1510_v17 = vsel %vm1506_vm10, %v1490_v44, %v1493_v63  ;;  %v1519_v12 = vsel %vm1509_vm11, %v1505_v13, 1326507024 }
 0x2d7   :  { %v1350_v25 = vxor.u32 2147483648, %v1349_v6  ;;  %v1516_v28 = vsel %vm1508_vm13, %v1499_v24, %v1515_v18  ;;  %v1646_v29 = vclz %v3940_v10  ;;  %v1512_v27 = vsel %vm1508_vm13, %v1496_v45, %v1511_v1  ;;  %v5046_v18 = vpop.permute.xlu1 %422 }
 0x2d8   :  { %v1517_v20 = vsel %vm1507_vm12, %v1514_v19, %v1516_v28  ;;  %v1520_v61 = vsel %vm1508_vm13, %v1502_v58, %v1519_v12  ;;  %v1352_v52 = vsub.s32 4, %v4895_v49  ;;  %v1513_v38 = vsel %vm1507_vm12, %v1510_v17, %v1512_v27 }
 0x2d9   :  { %v1351_v47 = vsel %vm1268_vm8, %v1350_v25, %v1349_v6  ;;  %v1521_v33 = vsel %vm1507_vm12, %v1518_v5, %v1520_v61  ;;  %v5014_v34 = vmul.u32.u64.low %v4953_v31, %v1517_v20  ;;  %v5015_v22 = vmul.u32.u64.high %v4953_v31, %v1517_v20, %v5014_v34 }
 0x2da   :  { %v1354_v3 = vsel %vm4991_vm9, %v4774_v55, %v1351_v47  ;;  %v3941_v44 = vadd.s32 4294967294, %v1646_v29  ;;  %v5022_v35 = vmul.u32.u64.low %v4953_v31, %v1521_v33  ;;  %v5023_v36 = vmul.u32.u64.high %v4953_v31, %v1521_v33, %v5022_v35 }
 0x2db   :  { %4465 = vcosq.f32 %v1354_v3  ;;  %v1459_v42 = vsel %vm4947_vm4, 0, %v4962_v53  ;;  %v1532_v39 = vadd.s32 1, %v5015_v22  ;;  %v1353_v41 = vsel %vm1268_vm8, %v1352_v52, %v4895_v49 }
 0x2dc   :  { %4467 = vsinq.f32 %v1354_v3  ;;  %vm3942_vm14 = vcmp.lt.s32.totalorder %v3941_v44, 0  ;;  %v1529_v24 = vmul.u32 %v4953_v31, %v1513_v38  ;;  %vm1531_vm15 = vc.u32 %v5023_v36, %v5014_v34 }
 0x2dd   :  { %v1649_v26 = vsel %vm3942_vm14, 0, %v3941_v44  ;;  %v1355_v32 = vsel %vm4991_vm9, 0, %v1353_v41  ;;  %v1634_v53 = vadd.s32 %v4925_v16, %v4937_v46  ;;  %v1533_v54 = vsel %vm1531_vm15, %v1532_v39, %v5015_v22  ;;  %v5053_v44 = vpop.permute.xlu1 %357 }
 0x2de   :  { %v1650_v63 = vsub.s32 32, %v1649_v26  ;;  %v1654_v45 = vsub.s32 4294967266, %v1649_v26  ;;  %v4462_v50 = vpop.eup %4461  ;;  %v1463_v51 = vadd.s32 3, %v1459_v42  ;;  %v1534_v49 = vadd.s32 %v1533_v54, %v1529_v24 }
 0x2df   :  { %v4464_v56 = vpop.eup %4463  ;;  %v1359_v59 = vadd.s32 3, %v1355_v32  ;;  %v1880_v0 = vand.u32 3, %v1459_v42  ;;  %v1777_v31 = vand.u32 3, %v1355_v32  ;;  %v1651_v6 = vshll.u32 %v4997_v57, %v1649_v26 }
 0x2e0   :  { %v1655_v4 = vadd.s32 127, %v1654_v45  ;;  %v1652_v48 = vshrl.u32 %v1634_v53, %v1650_v63  ;;  %v1535_v15 = vadd.s32 536870912, %v1534_v49  ;;  %v1467_v13 = vxor.u32 2147483648, %v4464_v56  ;;  %v2309_v53 = vld [vmem:[%s4768_s13 + $0x30] sm:$0xff] }
 0x2e1   :  { %v1360_v2 = vand.u32 3, %v1359_v59  ;;  %v1470_v1 = vxor.u32 2147483648, %v4462_v50  ;;  %v1464_v19 = vand.u32 3, %v1463_v51  ;;  %vm1881_vm0 = vcmp.lt.s32.totalorder %v1880_v0, 2  ;;  %v5077_v51 = vpop.permute.xlu1 %351 }
 0x2e2   :  { %v1656_v58 = vshll.u32 %v1655_v4, 23  ;;  %v5044_v10 = vshrl.u32 %v1535_v15, 30  ;;  %vm1882_vm1 = vcmp.eq.s32.totalorder %v1880_v0, 0  ;;  %v1653_v16 = vor.u32 %v1652_v48, %v1651_v6 }
 0x2e3   :  { %vm1778_vm2 = vcmp.lt.s32.totalorder %v1777_v31, 2  ;;  %vm1885_vm4 = vcmp.eq.s32.totalorder %v1880_v0, 2  ;;  %vm1779_vm6 = vcmp.eq.s32.totalorder %v1777_v31, 0  ;;  %vm1782_vm7 = vcmp.eq.s32.totalorder %v1777_v31, 2  ;;  %v2306_v31 = vld [vmem:[%s4768_s13 + $0x18] sm:$0xff] }
 0x2e4   :  { %v1657_v46 = vor.u32 4788187, %v1656_v58  ;;  %v1537_v5 = vshll.u32 %v5044_v10, 30  ;;  %v1884_v25 = vsel %vm1882_vm1, %v4462_v50, %v1467_v13  ;;  %vm1361_vm8 = vcmp.lt.s32.totalorder %v1360_v2, 2 }
 0x2e5   :  { %v1887_v57 = vsel %vm1885_vm4, %v1470_v1, %v4464_v56  ;;  %vm1466_vm9 = vcmp.eq.s32.totalorder %v1464_v19, 0  ;;  %vm1469_vm10 = vcmp.eq.s32.totalorder %v1464_v19, 2  ;;  %vm1362_vm11 = vcmp.eq.s32.totalorder %v1360_v2, 0 }
 0x2e6   :  { %v5049_v12 = vsub.s32 %v1534_v49, %v1537_v5  ;;  %v1468_v27 = vsel %vm1466_vm9, %v4462_v50, %v1467_v13  ;;  %v1471_v20 = vsel %vm1469_vm10, %v1470_v1, %v4464_v56  ;;  %v1658_v61 = vand.u32 2147483647, %v1657_v46  ;;  %v2305_v13 = vld [vmem:[%s4768_s13 + $0x10] sm:$0xff]  ;;  %v2303_v5 = vld [vmem:[%s4768_s13] sm:$0xff] }
 0x2e7   :  { %vm1365_vm12 = vcmp.eq.s32.totalorder %v1360_v2, 2  ;;  %vm1465_vm13 = vcmp.lt.s32.totalorder %v1464_v19, 2  ;;  %v1888_v38 = vsel %vm1881_vm0, %v1884_v25, %v1887_v57  ;;  %vm1358_vm14 = vweird.f32 %v4774_v55  ;;  %v5065_v55 = vpop.permute.xlu0 %354  ;;  %v2304_v19 = vld [vmem:[%s4768_s13 + $0x8] sm:$0xff] }
 0x2e8   :  { %v4466_v17 = vpop.eup %4465  ;;  %v1540_v33 = vsub.s32 0, %v5049_v12  ;;  %v1472_v42 = vsel %vm1465_vm13, %v1468_v27, %v1471_v20  ;;  %v1660_v63 = vcvt.s32.f32 %v1653_v16  ;;  %vm1462_vm15 = vweird.f32 %v4770_v43  ;;  %v2308_v43 = vld [vmem:[%s4768_s13 + $0x28] sm:$0xff]  ;;  %v4157_v16 = vpop.f32.mrf.mxu1 }
 0x2e9   :  { %v4468_v28 = vpop.eup %4467  ;;  %v1366_v29 = vxor.u32 2147483648, %v4466_v17  ;;  %v1889_v32 = vsel %vm1462_vm15, nan, %v1888_v38  ;;  %v1473_v56 = vsel %vm1462_vm15, nan, %v1472_v42  ;;  %vm364_vm0 = vcmp.eq.s32.totalorder %v5053_v44, %v4553_v9 }
 0x2ea   :  { %v1363_v47 = vxor.u32 2147483648, %v4468_v28  ;;  %v3936_v26 = vmin.u32 %v1540_v33, %v5049_v12  ;;  %v1661_v4 = vmul.f32 %v1660_v63, %v1658_v61  ;;  %v1530_v0 = vadd.s32 %v5014_v34, %v5023_v36 }
 0x2eb   :  { %v1784_v22 = vsel %vm1782_vm7, %v1366_v29, %v4468_v28  ;;  %v1367_v3 = vsel %vm1365_vm12, %v1366_v29, %v4468_v28  ;;  %vm5382_vm4 = vcmp.eq.s32.totalorder %v5077_v51, %v4553_v9  ;;  %vm5119_vm7 = vcmp.le.f32.partialorder %v1578_v7, 0.7853982 }
 0x2ec   :  { %v1781_v35 = vsel %vm1779_vm6, %v4466_v17, %v1363_v47  ;;  %v1364_v52 = vsel %vm1362_vm11, %v4466_v17, %v1363_v47  ;;  %v1542_v24 = vclz %v3936_v26  ;;  %v1662_v49 = vxor.u32 2147483648, %v1661_v4 }
 0x2ed   :  { %v1785_v39 = vsel %vm1778_vm2, %v1781_v35, %v1784_v22  ;;  %v1368_v41 = vsel %vm1361_vm8, %v1364_v52, %v1367_v3  ;;  %vm363_vm2 = vcmp.eq.s32.totalorder %v5065_v55, %v4553_v9  ;;  %vm1580_vm6 = vcmp.lt.s32.totalorder %v4783_v60, 0 }
 0x2ee   :  { %v1786_v45 = vsel %vm1358_vm14, nan, %v1785_v39  ;;  %v1369_v50 = vsel %vm1358_vm14, nan, %v1368_v41  ;;  %v3937_v54 = vadd.s32 4294967294, %v1542_v24  ;;  %v1663_v6 = vsel %vm1580_vm6, %v1662_v49, %v1661_v4 }
 0x2ef   :  { %4199 = vmatprep.mubr.msk.f32.mxu0 %vm521_vm5, %v1786_v45  ;;  %4209 = vmatprep.mubr.msk.f32.mxu1 %vm521_vm5, %v1369_v50  ;;  %v1664_v7 = vsub.s32 4, %v4976_v21  ;;  %vm1476_vm8 = vcmp.lt.s32.totalorder %v4790_v14, 0  ;;  %vm1475_vm9 = vcmp.le.f32.partialorder %v1474_v23, 0.7853982  ;;  %v5266_v40 = vsel %vm363_vm2, 1.0, %v4501_v11 }
 0x2f0   :  { %4200 = vmatmul.mubr.msk.f32.vlgmr.msra.gmra.mxu0 %vm521_vm5, %v1889_v32  ;;  %4210 = vmatmul.mubr.msk.f32.vlgmr.msra.gmra.mxu1 %vm521_vm5, %v1473_v56  ;;  %vm3938_vm1 = vcmp.lt.s32.totalorder %v3937_v54, 0 }
 0x2f1   :  { %4216 = vmatpush3.msra.mxu0 %v4777_v37  ;;  %4235 = vmatpush3.msk.msra.mxu1 %vm365_vm3, %v4522_v30  ;;  %v2307_v37 = vld [vmem:[%s4768_s13 + $0x20] sm:$0xff]  ;;  %v1545_v59 = vsel %vm3938_vm1, 0, %v3937_v54  ;;  %v1665_v20 = vsel %vm1580_vm6, %v1664_v7, %v4976_v21 }
 0x2f2   :  { %4217 = vmatprep.subr.mxu0 %v2309_v53  ;;  %4236 = vmatprep.subr.msk.mxu1 %vm364_vm0, %v4522_v30  ;;  %v1546_v48 = vsub.s32 32, %v1545_v59  ;;  %v1550_v58 = vsub.s32 4294967266, %v1545_v59  ;;  %v1547_v34 = vshll.u32 %v5049_v12, %v1545_v59  ;;  %v1560_v12 = vsub.s32 4, %v5044_v10 }
 0x2f3   :  { %4218 = vmatpush3.msra.mxu0 %v2309_v53  ;;  %4237 = vmatpush3.msk.msra.mxu1 %vm364_vm0, %v4522_v30  ;;  %v1667_v47 = vsel %vm5119_vm7, 0, %v1665_v20 }
 0x2f4   :  { %4219 = vmatprep.subr.mxu0 %v2308_v43  ;;  %4238 = vmatprep.subr.msk.mxu1 %vm363_vm2, %v4522_v30  ;;  %v1548_v36 = vshrl.u32 %v1530_v0, %v1546_v48  ;;  %v1551_v15 = vadd.s32 127, %v1550_v58  ;;  %v1561_v61 = vsel %vm1476_vm8, %v1560_v12, %v5044_v10  ;;  %v1671_v22 = vadd.s32 3, %v1667_v47 }
 0x2f5   :  { %4220 = vmatpush3.msra.mxu0 %v2308_v43  ;;  %4239 = vmatpush3.msk.msra.mxu1 %vm363_vm2, %v4522_v30  ;;  %v1563_v33 = vsel %vm1475_vm9, 0, %v1561_v61  ;;  %v2086_v38 = vand.u32 3, %v1667_v47  ;;  %v3967_v61 = vld [vmem:[%s3862_s29] ss:$0 sm:$0xff]  ;;  %s4537_s29 = smov 29  }
 0x2f6   :  { %4221 = vmatprep.subr.mxu0 %v2307_v37  ;;  %4240 = vmatprep.subr.msk.mxu1 %vm5382_vm4, %v4522_v30  ;;  %v1549_v2 = vor.u32 %v1548_v36, %v1547_v34  ;;  %v1552_v1 = vshll.u32 %v1551_v15, 23  ;;  %v1567_v52 = vadd.s32 3, %v1563_v33  ;;  %v1983_v23 = vand.u32 3, %v1563_v33  ;;  %v3892_v36 = vld [vmem:[%s3852_s17] ss:$0 sm:$0xff]  ;;  %s4533_s17 = smov 26   ;;  %s3872_s2 = sld [smem:[%s5381_s0 + %s4537_s29]]  }
 0x2f7   :  { %4222 = vmatpush3.msra.mxu0 %v2307_v37  ;;  %4241 = vmatpush3.msk.msra.mxu1 %vm5382_vm4, %v4522_v30  ;;  %v1666_v30 = vsel %vm5119_vm7, %v4783_v60, %v1663_v6  ;;  %v1672_v26 = vand.u32 3, %v1671_v22  ;;  %vm2091_vm13 = vcmp.eq.s32.totalorder %v2086_v38, 2  ;;  %vm2088_vm14 = vcmp.eq.s32.totalorder %v2086_v38, 0  ;;  %v2499_v6 = vld [vmem:[%s5163_s21 + $0x10] sm:$0xff]  ;;  %v3876_v47 = vld [vmem:[%s3856_s3] ss:$0 sm:$0xff]  ;;  %s5346_s20 = sld [smem:[%s5381_s0 + %s4533_s17]]  }
 0x2f8   :  { %4223 = vmatprep.subr.mxu0 %v2306_v31  ;;  %v1553_v46 = vor.u32 4788187, %v1552_v1  ;;  %v1556_v17 = vcvt.s32.f32 %v1549_v2  ;;  %4469 = vcosq.f32 %v1666_v30  ;;  %v1568_v41 = vand.u32 3, %v1567_v52  ;;  %v2498_v2 = vld [vmem:[%s5163_s21 + $0x8] sm:$0xff]  ;;  %v2497_v1 = vld [vmem:[%s5163_s21] sm:$0xff] }
 0x2f9   :  { %4224 = vmatpush3.msra.mxu0 %v2306_v31  ;;  %4471 = vsinq.f32 %v1666_v30  ;;  %vm1984_vm10 = vcmp.lt.s32.totalorder %v1983_v23, 2  ;;  %vm1985_vm11 = vcmp.eq.s32.totalorder %v1983_v23, 0  ;;  %vm1988_vm12 = vcmp.eq.s32.totalorder %v1983_v23, 2  ;;  %v207_v30 = vpop.f32.mrf.mxu1 }
 0x2fa   :  { %4225 = vmatprep.subr.mxu0 %v2305_v13  ;;  %v1554_v25 = vand.u32 2147483647, %v1553_v46  ;;  %vm1674_vm15 = vcmp.eq.s32.totalorder %v1672_v26, 0  ;;  %vm1677_vm1 = vcmp.eq.s32.totalorder %v1672_v26, 2  ;;  %vm1569_vm6 = vcmp.lt.s32.totalorder %v1568_v41, 2 }
 0x2fb   :  { %4226 = vmatpush3.msra.mxu0 %v2305_v13  ;;  %vm1570_vm7 = vcmp.eq.s32.totalorder %v1568_v41, 0  ;;  %vm1673_vm4 = vcmp.lt.s32.totalorder %v1672_v26, 2  ;;  %v2500_v13 = vld [vmem:[%s5163_s21 + $0x18] sm:$0xff]  ;;  %v4162_v46 = vpop.f32.mrf.mxu1 }
 0x2fc   :  { %4227 = vmatprep.subr.mxu0 %v2304_v19  ;;  %v1557_v57 = vmul.f32 %v1556_v17, %v1554_v25  ;;  %4245 = vmatprep.subr.mxu1 %v2500_v13 }
 0x2fd   :  { %4228 = vmatpush3.msra.mxu0 %v2304_v19  ;;  %v2700_v19 = vld [vmem:[%s5189_s25 + $0x18] sm:$0xff] }
 0x2fe   :  { %4229 = vmatprep.subr.mxu0 %v2303_v5  ;;  %v1558_v28 = vxor.u32 2147483648, %v1557_v57 }
 0x2ff   :  { %4230 = vmatpush3.msra.mxu0 %v2303_v5  ;;  %v311_v5 = vpop.f32.mrf.mxu1 }
 0x300   :  { %v1559_v29 = vsel %vm1476_vm8, %v1558_v28, %v1557_v57  ;;  %vm1573_vm8 = vcmp.eq.s32.totalorder %v1568_v41, 2  ;;  %v312_v52 = vadd.f32 %v3876_v47, %v311_v5  ;;  %v2698_v41 = vld [vmem:[%s5189_s25 + $0x8] sm:$0xff] }
 0x301   :  { %v1562_v27 = vsel %vm1475_vm9, %v4790_v14, %v1559_v29  ;;  %vm2087_vm9 = vcmp.lt.s32.totalorder %v2086_v38, 2  ;;  %v4165_v25 = vpop.f32.mrf.mxu1  ;;  %v317_v38 = vadd.f32 %v4162_v46, %v3876_v47 }
 0x302   :  { %4473 = vcosq.f32 %v1562_v27 }
 0x303   :  { %4475 = vsinq.f32 %v1562_v27  ;;  %v321_v17 = vpop.f32.mrf.mxu1 }
 0x305   :  { %v4470_v3 = vpop.eup %4469  ;;  %v4187_v57 = vpop.f32.mrf.mxu1 }
 0x306   :  { %v4472_v35 = vpop.eup %4471  ;;  %v1678_v42 = vxor.u32 2147483648, %v4470_v3 }
 0x307   :  { %v1675_v39 = vxor.u32 2147483648, %v4472_v35  ;;  %v1136_v7 = vpop.f32.mrf.mxu1 }
 0x308   :  { %v2093_v10 = vsel %vm2091_vm13, %v1678_v42, %v4472_v35  ;;  %v1679_v32 = vsel %vm1677_vm1, %v1678_v42, %v4472_v35  ;;  %vm424_vm13 = vcmp.eq.s32.totalorder %v4903_v62, %v4553_v9 }
 0x309   :  { %v2090_v50 = vsel %vm2088_vm14, %v4470_v3, %v1675_v39  ;;  %v1676_v24 = vsel %vm1674_vm15, %v4470_v3, %v1675_v39  ;;  %vm1566_vm14 = vweird.f32 %v4790_v14  ;;  %vm2311_vm15 = vcmask 523264   ;;  %v4194_v28 = vpop.f32.mrf.mxu1  ;;  %v2699_v39 = vld [vmem:[%s5189_s25 + $0x10] sm:$0xff] }
 0x30a   :  { %v2094_v37 = vsel %vm2087_vm9, %v2090_v50, %v2093_v10  ;;  %v1680_v49 = vsel %vm1673_vm4, %v1676_v24, %v1679_v32  ;;  %vm425_vm4 = vcmp.eq.s32.totalorder %v5046_v18, %v4553_v9  ;;  %v3895_v62 = vsel %vm424_vm13, 1.0, %v4501_v11 }
 0x30b   :  { %v3896_v14 = vsel %vm425_vm4, 1.0, %v4501_v11  ;;  %v1217_v12 = vpop.f32.mrf.mxu1 }
 0x30c   :  { %v1218_v10 = vadd.f32 %v1217_v12, %v1136_v7  ;;  %v2785_v7 = vld [vmem:[%s5232_s15 + $0x18] sm:$0xff]  ;;  %v2783_v12 = vld [vmem:[%s5232_s15 + $0x8] sm:$0xff] }
 0x30f   :  { %v4474_v21 = vpop.eup %4473 }
 0x310   :  { %v4476_v63 = vpop.eup %4475  ;;  %v1574_v45 = vxor.u32 2147483648, %v4474_v21 }
 0x311   :  { %v1571_v56 = vxor.u32 2147483648, %v4476_v63 }
 0x312   :  { %v1990_v53 = vsel %vm1988_vm12, %v1574_v45, %v4476_v63  ;;  %v1575_v4 = vsel %vm1573_vm8, %v1574_v45, %v4476_v63  ;;  %vm1670_vm12 = vweird.f32 %v4783_v60  ;;  %v5155_v60 = vshrl.u32 %v330_v8, 7  ;;  %v3873_v63 = vld [vmem:[%s3854_s7] ss:$0 sm:$0xff] }
 0x313   :  { %v1987_v54 = vsel %vm1985_vm11, %v4474_v21, %v1571_v56  ;;  %v1572_v43 = vsel %vm1570_vm7, %v4474_v21, %v1571_v56  ;;  %v2095_v31 = vsel %vm1670_vm12, nan, %v2094_v37  ;;  %v1681_v34 = vsel %vm1670_vm12, nan, %v1680_v49  ;;  %v2697_v21 = vld [vmem:[%s5189_s25] sm:$0xff] }
 0x314   :  { %v1991_v59 = vsel %vm1984_vm10, %v1987_v54, %v1990_v53  ;;  %v1576_v0 = vsel %vm1569_vm6, %v1572_v43, %v1575_v4  ;;  %v5166_v18 = vadd.s32 8, %v5155_v60  ;;  %vm2401_vm10 = vcmask 261120   ;;  %v3925_v45 = vld [vmem:[%s3859_s11] ss:$0 sm:$0xff] }
 0x315   :  { %v1992_v48 = vsel %vm1566_vm14, nan, %v1991_v59  ;;  %v1577_v58 = vsel %vm1566_vm14, nan, %v1576_v0  ;;  %vm410_vm11 = vcmp.eq.s32.totalorder %v3892_v36, %v5155_v60  ;;  %v208_v32 = vadd.f32 %v3873_v63, %v207_v30 }
 0x316   :  { %4202 = vmatprep.mubr.msk.f32.mxu0 %vm521_vm5, %v1992_v48  ;;  %4212 = vmatprep.mubr.msk.f32.mxu1 %vm521_vm5, %v1577_v58  ;;  %vm411_vm1 = vcmp.eq.s32.totalorder %v3892_v36, %v5166_v18  ;;  %v5171_v8 = vsel %vm410_vm11, 1.0, %v4501_v11  ;;  %v1233_v56 = vadd.f32 %v3925_v45, %v1218_v10  ;;  %v1223_v4 = vadd.f32 %v4194_v28, %v4187_v57  ;;  %v2784_v28 = vld [vmem:[%s5232_s15 + $0x10] sm:$0xff]  ;;  %v3994_v10 = vld [vmem:[%s5163_s21 + $0x28] sm:$0xff] }
 0x317   :  { %4203 = vmatmul.mubr.msk.f32.gmra.mxu0 %vm521_vm5, %v2095_v31  ;;  %4213 = vmatmul.mubr.msk.f32.gmra.mxu1 %vm521_vm5, %v1681_v34  ;;  %v5174_v15 = vsel %vm411_vm1, 1.0, %v4501_v11  ;;  %v322_v0 = vadd.f32 %v3876_v47, %v321_v17  ;;  %v213_v31 = vadd.f32 %v4157_v16, %v3873_v63  ;;  %v327_v34 = vadd.f32 %v4165_v25, %v3876_v47  ;;  %v3993_v63 = vld [vmem:[%s5163_s21 + $0x20] sm:$0xff] }
 0x318   :  { %4231 = vmatprep.mubr.msk.f32.mxu0 %vm2311_vm15, %v3895_v62  ;;  %4242 = vmatprep.mubr.msk.f32.mxu1 %vm2401_vm10, %v5171_v8  ;;  %v2393_v58 = vadd.f32 %v1233_v56, %v208_v32  ;;  %v1234_v62 = vadd.f32 %v3925_v45, %v1223_v4  ;;  %v5259_v47 = vsel %vm364_vm0, 1.0, %v4501_v11  ;;  %vm2484_vm0 = vcmp.eq.s32.totalorder %v5166_v18, %v4553_v9 }
 0x319   :  { %vm2483_vm2 = vcmp.eq.s32.totalorder %v5155_v60, %v4553_v9  ;;  %vm4535_vm12 = vmmov 0  }
 0x31b   :  { %4232 = vmatmul.mubr.msk.f32.vlgmr.msra.gmra.mxu0 %vm2311_vm15, %v3896_v14  ;;  %4243 = vmatmul.mubr.msk.f32.vlgmr.msra.gmra.mxu1 %vm2401_vm10, %v5174_v15 }
 0x31c   :  { %4267 = vmatprep.mubr.msk.f32.mxu0 %vm2401_vm10, %v5171_v8  ;;  %4246 = vmatpush3.msra.mxu1 %v2500_v13 }
 0x31d   :  { %4247 = vmatprep.subr.mxu1 %v2499_v6 }
 0x31e   :  { %4248 = vmatpush3.msra.mxu1 %v2499_v6 }
 0x31f   :  { %4249 = vmatprep.subr.mxu1 %v2498_v2 }
 0x320   :  { %4250 = vmatpush3.msra.mxu1 %v2498_v2  ;;  %v2394_v2 = vadd.f32 %v1234_v62, %v213_v31 }
 0x321   :  { %4251 = vmatprep.subr.mxu1 %v2497_v1 }
 0x322   :  { %4252 = vmatpush3.msra.mxu1 %v2497_v1 }
 0x323   :  { %4270 = vmatprep.subr.mxu1 %v2700_v19 }
 0x3b0   :  { %v4201_v29 = vpop.f32.mrf.mxu0  ;;  %v4211_v27 = vpop.f32.mrf.mxu1 }
 0x3b1   :  { %v2279_v20 = vadd.f32 %v4211_v27, %v4201_v29  ;;  %v2782_v29 = vld [vmem:[%s5232_s15] sm:$0xff]  ;;  %v5252_v27 = vsel %vm365_vm3, 1.0, %v4501_v11  ;;  %vm5393_vm3 = vcmp.eq.s32.totalorder %v5077_v51, %v4553_v9 }
 0x3b2   :  { %v2176_v33 = vpop.f32.mrf.mxu0  ;;  %v2273_v22 = vpop.f32.mrf.mxu1  ;;  %v5273_v44 = vsel %vm5393_vm3, 1.0, %v4501_v11 }
 0x3b3   :  { %v2274_v3 = vadd.f32 %v2273_v22, %v2176_v33  ;;  %v2300_v35 = vadd.f32 %v3967_v61, %v2279_v20 }
 0x3b5   :  { %v2299_v23 = vadd.f32 %v3967_v61, %v2274_v3  ;;  %v5200_v26 = vadd.f32 %v2300_v35, %v317_v38 }
 0x3b7   :  { %v5198_v42 = vadd.f32 %v2299_v23, %v312_v52 }
 0x3b9   :  { %4253 = vmatprep.mubr.msk.f32.mxu1 %vm2401_vm10, %v5198_v42 }
 0x3ba   :  { %4254 = vmatmul.mubr.msk.f32.vlgmr.msra.gmra.mxu1 %vm2401_vm10, %v5200_v26 }
 0x3bb   :  { %4271 = vmatpush3.msra.mxu1 %v2700_v19 }
 0x3bc   :  { %4272 = vmatprep.subr.mxu1 %v2699_v39 }
 0x3bd   :  { %4273 = vmatpush3.msra.mxu1 %v2699_v39 }
 0x3be   :  { %4274 = vmatprep.subr.mxu1 %v2698_v41 }
 0x3bf   :  { %4275 = vmatpush3.msra.mxu1 %v2698_v41  ;;  %v3996_v41 = vld [vmem:[%s5163_s21 + $0x38] sm:$0xff] }
 0x3c0   :  { %4276 = vmatprep.subr.mxu1 %v2697_v21 }
 0x3c1   :  { %4277 = vmatpush3.msra.mxu1 %v2697_v21  ;;  %v3995_v21 = vld [vmem:[%s5163_s21 + $0x30] sm:$0xff]  ;;  %s4534_s21 = smov 27  }
 0x3c2   :  { %s3870_s24 = sld [smem:[%s5381_s0 + %s4534_s21]]  }
 0x3d7   :  { %v4204_v50 = vpop.f32.mrf.mxu0  ;;  %v4214_v24 = vpop.f32.mrf.mxu1 }
 0x3d8   :  { %v2289_v53 = vadd.f32 %v4214_v24, %v4204_v50 }
 0x3d9   :  { %v2186_v54 = vpop.f32.mrf.mxu0  ;;  %v2283_v43 = vpop.f32.mrf.mxu1 }
 0x3da   :  { %v2284_v37 = vadd.f32 %v2283_v43, %v2186_v54  ;;  %v2302_v49 = vadd.f32 %v3967_v61, %v2289_v53  ;;  %v3002_v53 = vsub.s32 0, %v5155_v60  ;;  %v3977_v43 = vsel %vm2484_vm0, 1.0, %v4501_v11 }
 0x3db   :  { %v4233_v59 = vpop.f32.mrf.mxu0  ;;  %v5225_v19 = vpop.f32.mrf.mxu1 }
 0x3dc   :  { %v2301_v48 = vadd.f32 %v3967_v61, %v2284_v37  ;;  %v5217_v6 = vadd.f32 %v2302_v49, %v327_v34  ;;  %v2396_v1 = vadd.f32 %v4233_v59, %v2394_v2  ;;  %v2490_v4 = vmin.f32 %v5225_v19, 1.0 }
 0x3dd   :  { %v2384_v14 = vpop.f32.mrf.mxu0  ;;  %v5227_v16 = vpop.f32.mrf.mxu1  ;;  %v3976_v37 = vsel %vm2483_vm2, 1.0, %v4501_v11 }
 0x3de   :  { %v5215_v36 = vadd.f32 %v2301_v48, %v322_v0  ;;  %v2395_v13 = vadd.f32 %v2393_v58, %v2384_v14  ;;  %v2489_v54 = vmin.f32 %v5227_v16, 1.0  ;;  %v2492_v0 = vmax.f32 %v2490_v4, %v3977_v43  ;;  %v3990_v4 = vld [vmem:[%s5346_s20] ss:$0 sm:$0xff] }
 0x3e0   :  { %4256 = vmatprep.mubr.msk.f32.mxu1 %vm2401_vm10, %v5215_v36  ;;  %v2491_v18 = vmax.f32 %v2489_v54, %v3976_v37  ;;  %vm2494_vm6 = vcmp.gt.f32.partialorder %v2492_v0, 0.0 }
 0x3e1   :  { %4257 = vmatmul.mubr.msk.f32.gmra.mxu1 %vm2401_vm10, %v5217_v6 }
 0x3e2   :  { %4278 = vmatprep.mubr.msk.f32.mxu1 %vm2401_vm10, %v2395_v13  ;;  %vm2493_vm7 = vcmp.gt.f32.partialorder %v2491_v18, 0.0 }
 0x3e5   :  { %4279 = vmatmul.mubr.msk.f32.vlgmr.msra.gmra.mxu1 %vm2401_vm10, %v2396_v1 }
 0x47a   :  { %v4255_v30 = vpop.f32.mrf.mxu1 }
 0x47c   :  { %v2579_v46 = vpop.f32.mrf.mxu1 }
 0x4a1   :  { %v4258_v5 = vpop.f32.mrf.mxu1 }
 0x4a2   :  { %2615 = vperm.xlu0 %4451, %v4258_v5  }
 0x4a3   :  { %v2589_v25 = vpop.f32.mrf.mxu1 }
 0x4a4   :  { %2610 = vperm.xlu1 %4452, %v2589_v25  }
 0x4a5   :  { %v5234_v17 = vpop.f32.mrf.mxu1 }
 0x4a6   :  { %2605 = vperm.xlu0 %4451, %v4255_v30  }
 0x4a7   :  { %v5236_v57 = vpop.f32.mrf.mxu1 }
 0x4a8   :  { %2600 = vperm.xlu1 %4452, %v2579_v46   ;;  %4300 = vmatprep.mubr.msk.f32.mxu1 %vm2401_vm10, %v5236_v57 }
 0x4aa   :  { %2877 = vrot.lane.b32.xlu0 %v2785_v7, %s4531_s16 }
 0x4ac   :  { %2875 = vrot.lane.b32.xlu1 %v2784_v28, %s4531_s16 }
 0x4ae   :  { %2873 = vrot.lane.b32.xlu0 %v2783_v12, %s4531_s16 }
 0x4b0   :  { %2871 = vrot.lane.b32.xlu1 %v2782_v29, %s4531_s16 }
 0x51d   :  { %v2616_v20 = vpop.permute.xlu0 %2615 }
 0x51e   :  { %v2621_v61 = vmul.f32 %v5252_v27, %v2616_v20 }
 0x51f   :  { %v2611_v33 = vpop.permute.xlu1 %2610 }
 0x520   :  { %v2620_v22 = vmul.f32 %v5259_v47, %v2611_v33  ;;  %4259 = vmatprep.subr.mxu0 %v2621_v61 }
 0x521   :  { %4260 = vmatpush3.msra.mxu0 %v2621_v61  ;;  %v2606_v3 = vpop.permute.xlu0 %2605 }
 0x522   :  { %v2619_v35 = vmul.f32 %v5266_v40, %v2606_v3  ;;  %4261 = vmatprep.subr.mxu0 %v2620_v22 }
 0x523   :  { %4262 = vmatpush3.msra.mxu0 %v2620_v22  ;;  %v2601_v52 = vpop.permute.xlu1 %2600 }
 0x524   :  { %v2618_v23 = vmul.f32 %v5273_v44, %v2601_v52  ;;  %4263 = vmatprep.subr.mxu0 %v2619_v35 }
 0x525   :  { %v2878_v38 = vpop.permute.xlu0 %2877  ;;  %4264 = vmatpush3.msra.mxu0 %v2619_v35 }
 0x526   :  { %4265 = vmatprep.subr.mxu0 %v2618_v23  ;;  %4292 = vmatprep.subr.mxu1 %v2878_v38 }
 0x527   :  { %4266 = vmatpush3.msra.mxu0 %v2618_v23  ;;  %v2876_v55 = vpop.permute.xlu1 %2875  ;;  %4293 = vmatpush3.msra.mxu1 %v2878_v38 }
 0x528   :  { %4268 = vmatmul.mubr.msk.f32.vlgmr.msra.gmra.mxu0 %vm2401_vm10, %v5174_v15  ;;  %4281 = vmatprep.subr.mxu0 %v2785_v7 }
 0x529   :  { %4294 = vmatprep.subr.mxu1 %v2876_v55  ;;  %v2874_v51 = vpop.permute.xlu0 %2873  ;;  %4282 = vmatpush3.msra.mxu0 %v2785_v7 }
 0x52a   :  { %4289 = vmatprep.mubr.msk.f32.mxu0 %vm2401_vm10, %v5236_v57  ;;  %4295 = vmatpush3.msra.mxu1 %v2876_v55 }
 0x52b   :  { %4283 = vmatprep.subr.mxu0 %v2784_v28  ;;  %4296 = vmatprep.subr.mxu1 %v2874_v51  ;;  %v2872_v39 = vpop.permute.xlu1 %2871 }
 0x52c   :  { %4284 = vmatpush3.msra.mxu0 %v2784_v28  ;;  %4297 = vmatpush3.msra.mxu1 %v2874_v51 }
 0x52d   :  { %4285 = vmatprep.subr.mxu0 %v2783_v12  ;;  %4298 = vmatprep.subr.mxu1 %v2872_v39 }
 0x52e   :  { %4286 = vmatpush3.msra.mxu0 %v2783_v12  ;;  %4299 = vmatpush3.msra.mxu1 %v2872_v39 }
 0x52f   :  { %4287 = vmatprep.subr.mxu0 %v2782_v29  ;;  %4301 = vmatmul.mubr.msk.f32.vlgmr.msra.gmra.mxu1 %vm2401_vm10, %v5234_v17 }
 0x530   :  { %4310 = vmatprep.subr.mxu1 %v3996_v41  ;;  %4288 = vmatpush3.msra.mxu0 %v2782_v29 }
 0x531   :  { %4311 = vmatpush3.msra.mxu1 %v3996_v41  ;;  %4318 = vmatprep.mubr.msk.f32.mxu1 %vm2401_vm10, %v5198_v42 }
 0x532   :  { %4290 = vmatmul.mubr.msk.f32.vlgmr.msra.gmra.mxu0 %vm2401_vm10, %v5234_v17  ;;  %4303 = vmatprep.subr.mxu0 %v5234_v17 }
 0x533   :  { %4312 = vmatprep.subr.mxu1 %v3995_v21  ;;  %4304 = vmatpush3.msra.mxu0 %v5234_v17 }
 0x534   :  { %4313 = vmatpush3.msra.mxu1 %v3995_v21  ;;  %4305 = vmatprep.subr.mxu0 %v5236_v57 }
 0x535   :  { %4314 = vmatprep.subr.mxu1 %v3994_v10  ;;  %4306 = vmatpush3.msra.mxu0 %v5236_v57 }
 0x536   :  { %4315 = vmatpush3.msra.mxu1 %v3994_v10 }
 0x537   :  { %4316 = vmatprep.subr.mxu1 %v3993_v63 }
 0x538   :  { %4317 = vmatpush3.msra.mxu1 %v3993_v63 }
 0x539   :  { %4319 = vmatmul.mubr.msk.f32.vlgmr.msra.gmra.mxu1 %vm2401_vm10, %v5200_v26 }
 0x53a   :  { %4321 = vmatprep.mubr.msk.f32.mxu1 %vm2401_vm10, %v5215_v36  ;;  %v4532_v36 = vmov -1e+30  }
 0x53b   :  { %v5311_v13 = vsel %vm2494_vm6, 0.0, %v4532_v36  ;;  %v5313_v2 = vsel %vm2493_vm7, 0.0, %v4532_v36 }
 0x53d   :  { %4322 = vmatmul.mubr.msk.f32.gmra.mxu1 %vm2401_vm10, %v5217_v6 }
 0x5e8   :  { %v4269_v42 = vpop.f32.mrf.mxu0 }
 0x5ea   :  { %v2688_v45 = vpop.f32.mrf.mxu0 }
 0x5ef   :  { %v4302_v32 = vpop.f32.mrf.mxu1 }
 0x5f1   :  { %v2949_v56 = vpop.f32.mrf.mxu1 }
 0x5f2   :  { %v4291_v50 = vpop.f32.mrf.mxu0 }
 0x5f3   :  { %2997 = vperm.xlu1 %4452, %v4291_v50  }
 0x5f4   :  { %v2858_v24 = vpop.f32.mrf.mxu0 }
 0x5f5   :  { %2992 = vperm.xlu0 %4451, %v2858_v24   ;;  %v4003_v24 = vld [vmem:[%s5189_s25 + $0x20] sm:$0xff] }
 0x5f9   :  { %v4320_v33 = vpop.f32.mrf.mxu1 }
 0x5fb   :  { %v3199_v22 = vpop.f32.mrf.mxu1 }
 0x5fd   :  { %v4323_v3 = vpop.f32.mrf.mxu1 }
 0x5ff   :  { %v3209_v35 = vpop.f32.mrf.mxu1 }
 0x613   :  { %2958 = vxpose.xlu0.b32.start [1/2] (short) (narrow) %v2949_v56, 8  ;;  %v4011_v56 = vld [vmem:[%s5232_s15 + $0x30] sm:$0xff] }
 0x617   :  { %2959 = vxpose.xlu0.b32.end [2/2] (short) (narrow) %v4302_v32, 8  ;;  %v4010_v32 = vld [vmem:[%s5232_s15 + $0x28] sm:$0xff] }
 0x66e   :  { %v2998_v48 = vpop.permute.xlu1 %2997 }
 0x670   :  { %v2993_v26 = vpop.permute.xlu0 %2992 }
 0x68f   :  { %v2974_v49 = vpop.trf.xlu0 }
 0x690   :  { %v3003_v59 = vrot.slane %v2974_v49, %v3002_v53 }
 0x692   :  { %v3004_v58 = vadd.f32 %v3003_v59, %v2993_v26  ;;  %v3005_v9 = vadd.f32 %v3003_v59, %v2998_v48 }
 0x694   :  { %v3006_v31 = vadd.f32 %v3004_v58, %v2688_v45  ;;  %v3007_v34 = vadd.f32 %v4269_v42, %v3005_v9 }
 0x696   :  { %vm3009_vm8 = vcmp.gt.f32.partialorder %v3007_v34, 0.0  ;;  %v3011_v62 = vmul.f32 0.2, %v3007_v34  ;;  %vm3008_vm9 = vcmp.gt.f32.partialorder %v3006_v31, 0.0  ;;  %v3010_v14 = vmul.f32 0.2, %v3006_v31 }
 0x698   :  { %v3013_v6 = vsel %vm3009_vm8, %v3007_v34, %v3011_v62  ;;  %v3012_v1 = vsel %vm3008_vm9, %v3006_v31, %v3010_v14 }
 0x699   :  { %v3015_v19 = vadd.f32 %v3013_v6, %v5311_v13  ;;  %v3014_v16 = vadd.f32 %v3012_v1, %v5313_v2 }
 0x69b   :  { %v3019_v30 = vsel %vm521_vm5, %v3015_v19, -inf  ;;  %v3016_v46 = vsel %vm521_vm5, %v3014_v16, -inf }
 0x69c   :  { %3020 = vmax.xlane.f32.xlu0 %v3019_v30  ;;  %3017 = vmax.xlane.f32.xlu1 %v3016_v46 }
 0x6b2   :  { %3495 = vrot.lane.b32.xlu0 %v4010_v32, %s4531_s16 }
 0x725   :  { %v3021_v5 = vpop.xlane.xlu0 %3020  ;;  %v3018_v25 = vpop.xlane.xlu1 %3017 }
 0x726   :  { %v3023_v17 = vsub.f32 %v3015_v19, %v3021_v5  ;;  %v3022_v57 = vsub.f32 %v3014_v16, %v3018_v25 }
 0x728   :  { %v3024_v7 = vmul.f32 1.442695, %v3022_v57  ;;  %v3026_v28 = vmul.f32 1.442695, %v3023_v17 }
 0x729   :  { %v3496_v48 = vpop.permute.xlu0 %3495 }
 0x72a   :  { %4477 = vpow2.f32 %v3024_v7 }
 0x72b   :  { %4479 = vpow2.f32 %v3026_v28 }
 0x737   :  { %v4478_v12 = vpop.eup %4477 }
 0x738   :  { %v3028_v29 = vsel %vm521_vm5, %v4478_v12, 0.0  ;;  %v4480_v20 = vpop.eup %4479 }
 0x739   :  { %3029 = vadd.xlane.f32.xlu1 %v3028_v29  ;;  %v3031_v61 = vsel %vm521_vm5, %v4480_v20, 0.0 }
 0x73d   :  { %3032 = vadd.xlane.f32.xlu1 %v3031_v61 }
 0x74e   :  { %3235 = vperm.xlu1 %4452, %v4323_v3  }
 0x752   :  { %3230 = vperm.xlu1 %4452, %v3209_v35  }
 0x756   :  { %3225 = vperm.xlu1 %4452, %v4320_v33  }
 0x75a   :  { %3220 = vperm.xlu1 %4452, %v3199_v22  }
 0x7c2   :  { %v3030_v52 = vpop.xlane.xlu1 %3029 }
 0x7c3   :  { %4481 = vrcp.f32 %v3030_v52 }
 0x7c6   :  { %v3033_v23 = vpop.xlane.xlu1 %3032 }
 0x7c7   :  { %4483 = vrcp.f32 %v3033_v23 }
 0x7ca   :  { %v3236_v38 = vpop.permute.xlu1 %3235 }
 0x7cb   :  { %v3241_v55 = vmul.f32 %v5252_v27, %v3236_v38 }
 0x7cd   :  { %4324 = vmatprep.subr.mxu0 %v3241_v55 }
 0x7ce   :  { %v3231_v51 = vpop.permute.xlu1 %3230 }
 0x7cf   :  { %v3240_v42 = vmul.f32 %v5259_v47, %v3231_v51  ;;  %v4006_v47 = vld [vmem:[%s5189_s25 + $0x38] sm:$0xff] }
 0x7d0   :  { %v4482_v39 = vpop.eup %4481  ;;  %4335 = vmatprep.subr.mxu1 %v4006_v47 }
 0x7d1   :  { %v3036_v41 = vmul.f32 %v4482_v39, %v4478_v12  ;;  %4336 = vmatpush3.msra.mxu1 %v4006_v47 }
 0x7d2   :  { %v3226_v21 = vpop.permute.xlu1 %3225 }
 0x7d3   :  { %4307 = vmatprep.mubr.msk.f32.mxu0 %vm521_vm5, %v3036_v41  ;;  %v3239_v27 = vmul.f32 %v5266_v40, %v3226_v21  ;;  %v4004_v40 = vld [vmem:[%s5189_s25 + $0x28] sm:$0xff] }
 0x7d4   :  { %v4484_v10 = vpop.eup %4483 }
 0x7d5   :  { %v3037_v63 = vmul.f32 %v4484_v10, %v4480_v20 }
 0x7d6   :  { %v3221_v45 = vpop.permute.xlu1 %3220 }
 0x7d7   :  { %4308 = vmatmul.mubr.msk.f32.vlgmr.msra.gmra.mxu0 %vm521_vm5, %v3037_v63  ;;  %v3238_v50 = vmul.f32 %v5273_v44, %v3221_v45  ;;  %v4012_v44 = vld [vmem:[%s5232_s15 + $0x38] sm:$0xff]  ;;  %v3750_v45 = vld [vmem:[%s3870_s24 + $0x10] sm:$0xff] }
 0x7d8   :  { %4325 = vmatpush3.msra.mxu0 %v3241_v55  ;;  %4332 = vmatprep.mubr.msk.f32.mxu0 %vm2401_vm10, %v5171_v8  ;;  %v4005_v8 = vld [vmem:[%s5189_s25 + $0x30] sm:$0xff]  ;;  %s4536_s25 = smov 28  }
 0x7d9   :  { %4326 = vmatprep.subr.mxu0 %v3240_v42  ;;  %4337 = vmatprep.subr.mxu1 %v4005_v8  ;;  %s3871_s28 = sld [smem:[%s5381_s0 + %s4536_s25]]  }
 0x7da   :  { %4327 = vmatpush3.msra.mxu0 %v3240_v42  ;;  %4338 = vmatpush3.msra.mxu1 %v4005_v8  ;;  %v3751_v42 = vld [vmem:[%s3870_s24 + $0x18] sm:$0xff] }
 0x7db   :  { %4328 = vmatprep.subr.mxu0 %v3239_v27  ;;  %4339 = vmatprep.subr.mxu1 %v4004_v40 }
 0x7dc   :  { %4329 = vmatpush3.msra.mxu0 %v3239_v27  ;;  %4340 = vmatpush3.msra.mxu1 %v4004_v40  ;;  %v3749_v27 = vld [vmem:[%s3870_s24 + $0x8] sm:$0xff]  ;;  %v4018_v40 = vld [vmem:[%s5346_s20 + $0x1] ss:$0 sm:$0xff] }
 0x7dd   :  { %4330 = vmatprep.subr.mxu0 %v3238_v50  ;;  %3499 = vrot.lane.b32.xlu1 %v4012_v44, %s4531_s16 }
 0x7de   :  { %4331 = vmatpush3.msra.mxu0 %v3238_v50  ;;  %4341 = vmatprep.subr.mxu1 %v4003_v24  ;;  %v3748_v50 = vld [vmem:[%s3870_s24] sm:$0xff] }
 0x7df   :  { %4333 = vmatmul.mubr.msk.f32.vlgmr.msra.gmra.mxu0 %vm2401_vm10, %v5174_v15  ;;  %4342 = vmatpush3.msra.mxu1 %v4003_v24  ;;  %v4009_v15 = vld [vmem:[%s5232_s15 + $0x20] sm:$0xff]  ;;  %v64_v47 = vstv %s3871_s28 }
 0x7e0   :  { %4346 = vmatprep.subr.mxu0 %v4012_v44  ;;  %65 = vst [vmem:[#allocation2] sm:$0x1] %v64_v47 }
 0x7e1   :  { %4347 = vmatpush3.msra.mxu0 %v4012_v44  ;;  %3497 = vrot.lane.b32.xlu1 %v4011_v56, %s4531_s16 }
 0x7e2   :  { %4348 = vmatprep.subr.mxu0 %v4011_v56 }
 0x7e3   :  { %4349 = vmatpush3.msra.mxu0 %v4011_v56 }
 0x7e4   :  { %4350 = vmatprep.subr.mxu0 %v4010_v32 }
 0x7e5   :  { %4351 = vmatpush3.msra.mxu0 %v4010_v32  ;;  %3493 = vrot.lane.b32.xlu1 %v4009_v15, %s4531_s16 }
 0x7e6   :  { %4352 = vmatprep.subr.mxu0 %v4009_v15 }
 0x7e7   :  { %4353 = vmatpush3.msra.mxu0 %v4009_v15  ;;  %v4021_v32 = vld [vmem:[#allocation2] ss:$0 sm:$0xff] }
 0x84f   :  { %v3500_v26 = vpop.permute.xlu1 %3499 }
 0x850   :  { %4357 = vmatprep.subr.mxu1 %v3500_v26 }
 0x853   :  { %v3498_v18 = vpop.permute.xlu1 %3497 }
 0x857   :  { %v3494_v58 = vpop.permute.xlu1 %3493 }
 0x897   :  { %v4309_v54 = vpop.f32.mrf.mxu0 }
 0x898   :  { %v3123_v43 = vadd.f32 %v4309_v54, %v3990_v4 }
 0x899   :  { %v3117_v37 = vpop.f32.mrf.mxu0 }
 0x89a   :  { %v3118_v49 = vadd.f32 %v3990_v4, %v3117_v37  ;;  %v3127_v0 = vmax.f32 %v3123_v43, 0.0 }
 0x89c   :  { %v3126_v59 = vmax.f32 %v3118_v49, 0.0 }
 0x89e   :  { %4343 = vmatprep.mubr.msk.f32.mxu1 %vm2401_vm10, %v3126_v59 }
 0x89f   :  { %4344 = vmatmul.mubr.msk.f32.vlgmr.msra.gmra.mxu1 %vm2401_vm10, %v3127_v0  ;;  %v4334_v34 = vpop.f32.mrf.mxu0 }
 0x8a0   :  { %4358 = vmatpush3.msra.mxu1 %v3500_v26 }
 0x8a1   :  { %4359 = vmatprep.subr.mxu1 %v3498_v18  ;;  %v3308_v62 = vpop.f32.mrf.mxu0 }
 0x8a2   :  { %4360 = vmatpush3.msra.mxu1 %v3498_v18 }
 0x8a3   :  { %4361 = vmatprep.subr.mxu1 %v3496_v48 }
 0x8a4   :  { %4362 = vmatpush3.msra.mxu1 %v3496_v48 }
 0x8a5   :  { %4363 = vmatprep.subr.mxu1 %v3494_v58 }
 0x8a6   :  { %4364 = vmatpush3.msra.mxu1 %v3494_v58 }
 0x95f   :  { %v4345_v9 = vpop.f32.mrf.mxu1 }
 0x960   :  { %4368 = vmatprep.subr.mxu0 %v4345_v9 }
 0x961   :  { %v3394_v31 = vpop.f32.mrf.mxu1 }
 0x962   :  { %4354 = vmatprep.mubr.msk.f32.mxu0 %vm2401_vm10, %v3394_v31  ;;  %4365 = vmatprep.mubr.msk.f32.mxu1 %vm2401_vm10, %v3394_v31 }
 0x963   :  { %4355 = vmatmul.mubr.msk.f32.vlgmr.msra.gmra.mxu0 %vm2401_vm10, %v4345_v9  ;;  %4366 = vmatmul.mubr.msk.f32.vlgmr.msra.gmra.mxu1 %vm2401_vm10, %v4345_v9 }
 0x964   :  { %4369 = vmatpush3.msra.mxu0 %v4345_v9 }
 0x965   :  { %4370 = vmatprep.subr.mxu0 %v3394_v31 }
 0x966   :  { %4371 = vmatpush3.msra.mxu0 %v3394_v31 }
 0x967   :  { %4375 = vmatprep.subr.mxu0 %v4501_v11 }
 0xa23   :  { %v4356_v14 = vpop.f32.mrf.mxu0  ;;  %v4367_v6 = vpop.f32.mrf.mxu1 }
 0xa24   :  { %3619 = vperm.xlu1 %4452, %v4356_v14  }
 0xa25   :  { %v3480_v36 = vpop.f32.mrf.mxu0  ;;  %v3571_v1 = vpop.f32.mrf.mxu1 }
 0xa28   :  { %3614 = vperm.xlu1 %4452, %v3480_v36  }
 0xa51   :  { %3580 = vxpose.xlu1.b32.start [1/2] (short) (narrow) %v3571_v1, 8 }
 0xa55   :  { %3581 = vxpose.xlu1.b32.end [2/2] (short) (narrow) %v4367_v6, 8 }
 0xa9f   :  { %v3620_v19 = vpop.permute.xlu1 %3619 }
 0xaa3   :  { %v3615_v16 = vpop.permute.xlu1 %3614 }
 0xacd   :  { %v3596_v30 = vpop.trf.xlu1 }
 0xace   :  { %v3625_v46 = vrot.slane %v3596_v30, %v3002_v53 }
 0xad0   :  { %v3626_v5 = vadd.f32 %v3625_v46, %v3615_v16  ;;  %v3627_v25 = vadd.f32 %v3625_v46, %v3620_v19 }
 0xad2   :  { %v3628_v17 = vadd.f32 %v3626_v5, %v3308_v62  ;;  %v3629_v57 = vadd.f32 %v4334_v34, %v3627_v25 }
 0xad4   :  { %vm3630_vm13 = vcmp.gt.f32.partialorder %v3628_v17, 0.0  ;;  %v3632_v7 = vmul.f32 0.2, %v3628_v17  ;;  %vm3631_vm14 = vcmp.gt.f32.partialorder %v3629_v57, 0.0  ;;  %v3633_v28 = vmul.f32 0.2, %v3629_v57 }
 0xad6   :  { %v3634_v12 = vsel %vm3630_vm13, %v3628_v17, %v3632_v7  ;;  %v3635_v29 = vsel %vm3631_vm14, %v3629_v57, %v3633_v28 }
 0xad7   :  { %v3636_v20 = vadd.f32 %v3634_v12, %v5313_v2  ;;  %v3637_v33 = vadd.f32 %v3635_v29, %v5311_v13 }
 0xad9   :  { %v3638_v61 = vsel %vm521_vm5, %v3636_v20, -inf  ;;  %v3641_v60 = vsel %vm521_vm5, %v3637_v33, -inf }
 0xada   :  { %3639 = vmax.xlane.f32.xlu0 %v3638_v61 }
 0xade   :  { %3642 = vmax.xlane.f32.xlu0 %v3641_v60 }
 0xb63   :  { %v3640_v53 = vpop.xlane.xlu0 %3639 }
 0xb64   :  { %v3644_v22 = vsub.f32 %v3636_v20, %v3640_v53 }
 0xb66   :  { %v3646_v3 = vmul.f32 1.442695, %v3644_v22 }
 0xb67   :  { %v3643_v35 = vpop.xlane.xlu0 %3642 }
 0xb68   :  { %4485 = vpow2.f32 %v3646_v3  ;;  %v3645_v52 = vsub.f32 %v3637_v33, %v3643_v35 }
 0xb6a   :  { %v3648_v23 = vmul.f32 1.442695, %v3645_v52 }
 0xb6c   :  { %4487 = vpow2.f32 %v3648_v23 }
 0xb75   :  { %v4486_v38 = vpop.eup %4485 }
 0xb76   :  { %v3650_v55 = vsel %vm521_vm5, %v4486_v38, 0.0 }
 0xb77   :  { %3651 = vadd.xlane.f32.xlu0 %v3650_v55 }
 0xb79   :  { %v4488_v2 = vpop.eup %4487 }
 0xb7a   :  { %v3653_v51 = vsel %vm521_vm5, %v4488_v2, 0.0 }
 0xb7b   :  { %3654 = vadd.xlane.f32.xlu1 %v3653_v51 }
 0xc00   :  { %v3652_v13 = vpop.xlane.xlu0 %3651 }
 0xc01   :  { %4489 = vrcp.f32 %v3652_v13 }
 0xc04   :  { %v3655_v39 = vpop.xlane.xlu1 %3654 }
 0xc05   :  { %4491 = vrcp.f32 %v3655_v39 }
 0xc0e   :  { %v4490_v41 = vpop.eup %4489 }
 0xc0f   :  { %v3658_v21 = vmul.f32 %v4490_v41, %v4486_v38 }
 0xc11   :  { %4372 = vmatprep.mubr.msk.f32.mxu0 %vm521_vm5, %v3658_v21 }
 0xc12   :  { %v4492_v10 = vpop.eup %4491 }
 0xc13   :  { %v3659_v63 = vmul.f32 %v4492_v10, %v4488_v2 }
 0xc15   :  { %4373 = vmatmul.mubr.msk.f32.vlgmr.msra.gmra.mxu0 %vm521_vm5, %v3659_v63  ;;  %vm3838_vm5 = vcmask 3072  }
 0xc16   :  { %4376 = vmatpush3.msra.mxu0 %v3751_v42  ;;  %4383 = vmatprep.mubr.msk.f32.mxu0 %vm4535_vm12, %v4501_v11 }
 0xc17   :  { %4377 = vmatprep.subr.mxu0 %v4501_v11 }
 0xc18   :  { %4378 = vmatpush3.msra.mxu0 %v3750_v45 }
 0xc19   :  { %4379 = vmatprep.subr.mxu0 %v4501_v11 }
 0xc1a   :  { %4380 = vmatpush3.msra.mxu0 %v3749_v27 }
 0xc1b   :  { %4381 = vmatprep.subr.mxu0 %v4501_v11 }
 0xc1c   :  { %4382 = vmatpush3.msra.mxu0 %v3748_v50 }
 0xcd5   :  { %v4374_v8 = vpop.f32.mrf.mxu0 }
 0xcd7   :  { %v3740_v24 = vpop.f32.mrf.mxu0 }
 0xcd8   :  { %v3741_v44 = vadd.f32 %v4018_v40, %v3740_v24 }
 0xcda   :  { %4384 = vmatmul.mubr.msk.f32.vlgmr.msra.gmra.mxu0 %vm2401_vm10, %v3741_v44 }
 0xd9a   :  { %v3828_v56 = vpop.f32.mrf.mxu0 }
 0xd9b   :  { %v3829_v15 = vadd.f32 %v4021_v32, %v3828_v56 }
 0xd9c   :  { %v4385_v26 = vpop.f32.mrf.mxu0 }
 0xd9d   :  { %v3832_v4 = vsub.f32 0.0, %v3829_v15 }
 0xd9f   :  { %v3833_v11 = vmul.f32 1.442695, %v3832_v4 }
 0xda1   :  { %4493 = vpow2.f32 %v3833_v11 }
 0xdae   :  { %v4494_v54 = vpop.eup %4493 }
 0xdaf   :  { %v3835_v43 = vadd.f32 1.0, %v4494_v54 }
 0xdb1   :  { %4495 = vrcp.f32 %v3835_v43 }
 0xdbe   :  { %v4496_v37 = vpop.eup %4495 }
 0xdbf   :  { %3839 = vst.msk [vmem:[%s3872_s2] sm:$0xf] %vm3838_vm5, %v4496_v37 }

</bundles_post_ra>
